<compile_context>
chip_gen: v6e
topology: v6e:2x2x1
jax: 0.10.0
libtpu: 0.0.40
codegen_flags: <defaults>
</compile_context>

<pallas_src>
import functools

import jax
import jax.numpy as jnp
from jax.experimental import pallas as pl
from jax.experimental.pallas import tpu as pltpu

NUM_DOMAINS = 8            # len(DomainType)
_NEG_BIG = -1e30           # pad-lane bias => exp underflows to exactly 0 after max-subtraction
_MEGACORE_MIN_ROWS = 512   # only split the batch across >=2 grid steps above this size


def _round_up(n, m):
    return ((n + m - 1) // m) * m


def _softmax_last(x):
    # Exact normalization (no approx reciprocal): rows sum to 1 to f32 rounding
    # and match jax.nn.softmax to ~1e-7.
    m = jnp.max(x, axis=-1, keepdims=True)
    e = jnp.exp(x - m)
    return e / jnp.sum(e, axis=-1, keepdims=True)


def domain_router_kernel(
    x_ref,                      # [TB, D]     f32 (cast to bf16 in-kernel)
    wcat_ref, bcat_ref,         # [D, 768]    bf16, [1, 768] f32   (w1 | wd1 fused)
    w2_ref, b2_ref,             # [512, 256]  bf16, [1, 256] f32
    w3_ref, b3_ref,             # [256, P]    bf16, [1, P]   f32   (experts at lanes [0, E))
    wd2_ref, bd2_ref,           # [256, P]    bf16, [1, P]   f32   (domains at lanes [E, E+ND))
    out_ref,                    # [TB, P]     f32  packed: expert + domain softmaxes
    *, h1_dim,
):
    bf16 = jnp.bfloat16
    # Cast inside the kernel: the f32->bf16 cast rides the VPU under the input
    # DMA instead of being a separate HBM round trip in the wrapper.
    x = x_ref[...].astype(bf16)

    # Fused first layer: x @ [w1 | wd1] -> [TB, 512 + 256] in one MXU pass over x.
    hcat = jnp.dot(x, wcat_ref[...], preferred_element_type=jnp.float32)
    hcat = jnp.maximum(hcat + bcat_ref[...], 0.0)             # bias / ReLU in f32

    h1 = hcat[:, :h1_dim].astype(bf16)                        # router branch  [TB, 512]
    hd = hcat[:, h1_dim:].astype(bf16)                        # domain branch  [TB, 256]

    # Router: Linear(512->256) + ReLU -> Linear(256->E) -> Softmax
    h2 = jnp.dot(h1, w2_ref[...], preferred_element_type=jnp.float32)
    h2 = jnp.maximum(h2 + b2_ref[...], 0.0).astype(bf16)
    logits_e = jnp.dot(h2, w3_ref[...], preferred_element_type=jnp.float32) + b3_ref[...]

    # Domain classifier: Linear(256->ND) -> Softmax (real lanes offset to [E, E+ND))
    logits_d = jnp.dot(hd, wd2_ref[...], preferred_element_type=jnp.float32) + bd2_ref[...]

    # Padded lanes of each softmax are exactly 0 (bias -1e30), so a single add
    # packs both distributions into one lane-dense store (halves writeback).
    out_ref[...] = _softmax_last(logits_e) + _softmax_last(logits_d)


def prepare_params(p):
    """One-time prep: fuse first-layer weights, pad/offset the two final layers
    into a shared packed output tile of width P, cast weights to bf16 (biases f32)."""
    bf, f32 = jnp.bfloat16, jnp.float32
    E = int(p["w3"].shape[1])
    ND = NUM_DOMAINS
    P = _round_up(E + ND, 128)

    wcat = jnp.concatenate([p["w1"], p["wd1"]], axis=1).astype(bf)    # [D, 768]
    bcat = jnp.concatenate([p["b1"], p["bd1"]], axis=1).astype(f32)   # [1, 768]

    # Experts occupy lanes [0, E); domains occupy lanes [E, E+ND).
    w3p = jnp.zeros((p["w3"].shape[0], P), bf).at[:, :E].set(p["w3"].astype(bf))
    b3p = jnp.full((1, P), _NEG_BIG, f32).at[:, :E].set(p["b3"].astype(f32))
    wd2p = jnp.zeros((p["wd2"].shape[0], P), bf).at[:, E:E + ND].set(p["wd2"].astype(bf))
    bd2p = jnp.full((1, P), _NEG_BIG, f32).at[:, E:E + ND].set(p["bd2"].astype(f32))

    return {
        "wcat": wcat, "bcat": bcat,
        "w2": p["w2"].astype(bf), "b2": p["b2"].astype(f32),
        "w3p": w3p, "b3p": b3p,
        "wd2p": wd2p, "bd2p": bd2p,
        "h1_dim": int(p["w1"].shape[1]),
        "num_experts": E,
        "packed_width": P,
    }


def domain_router_forward(x, prep, *, max_block_rows=1024):
    """x: [B, embedding_dim] float32.  Returns (expert_weights, domain_probs)."""
    B, D = x.shape
    E = prep["num_experts"]
    ND = NUM_DOMAINS
    P = prep["packed_width"]

    # Batch tiling: sublane-align, then tile the batch axis with the largest
    # tile that amortizes per-step overhead; weights stay VMEM-resident
    # (constant index_map) while the x / packed-out tiles are double-buffered.
    B8 = _round_up(B, 8)
    TB = min(B8, max_block_rows)
    # Megacore (v7x): only force >=2 grid steps when the batch is big enough
    # that duplicating the ~1.5 MiB resident-weight DMA per core pays off.
    if B8 >= _MEGACORE_MIN_ROWS and B8 // TB < 2:
        TB = _round_up((B8 + 1) // 2, 8)
    B_pad = _round_up(B8, TB)
    if B_pad != B:
        x = jnp.pad(x, ((0, B_pad - B), (0, 0)))
    num_blocks = B_pad // TB

    weight_args = (prep["wcat"], prep["bcat"], prep["w2"], prep["b2"],
                   prep["w3p"], prep["b3p"], prep["wd2p"], prep["bd2p"])
    full = lambda arr: pl.BlockSpec(arr.shape, lambda i: (0, 0))
    kernel = functools.partial(domain_router_kernel, h1_dim=prep["h1_dim"])

    weight_bytes = sum(int(w.size) * w.dtype.itemsize for w in weight_args)
    cost = pl.CostEstimate(
        flops=2 * B_pad * (D * 768 + 512 * 256 + 2 * 256 * P),
        transcendentals=2 * B_pad * P,
        bytes_accessed=int(x.size) * 4 + weight_bytes + B_pad * P * 4,
    )

    packed = pl.pallas_call(
        kernel,
        out_shape=jax.ShapeDtypeStruct((B_pad, P), jnp.float32),
        grid=(num_blocks,),
        in_specs=[pl.BlockSpec((TB, D), lambda i: (i, 0))]        # x: tiled over batch
                 + [full(w) for w in weight_args],                # weights: VMEM-resident
        out_specs=pl.BlockSpec((TB, P), lambda i: (i, 0)),        # single packed lane-dense output
        compiler_params=pltpu.CompilerParams(
            dimension_semantics=("parallel",) if num_blocks > 1 else ("arbitrary",),
            vmem_limit_bytes=32 << 20,
        ),
        cost_estimate=cost,
    )(x, *weight_args)

    return packed[:B, :E], packed[:B, E:E + ND]


def init_params(key, embedding_dim, num_experts):
    """Deterministic synthetic parameters. Weights stored as [in, out] (pre-transposed)."""
    ks = jax.random.split(key, 10)
    s = 0.02

    def w(k, shape):
        return jax.random.normal(k, shape, dtype=jnp.float32) * s

    return {
        # router MLP
        "w1": w(ks[0], (embedding_dim, 512)), "b1": w(ks[1], (1, 512)),
        "w2": w(ks[2], (512, 256)),           "b2": w(ks[3], (1, 256)),
        "w3": w(ks[4], (256, num_experts)),   "b3": w(ks[5], (1, num_experts)),
        # domain classifier MLP
        "wd1": w(ks[6], (embedding_dim, 256)), "bd1": w(ks[7], (1, 256)),
        "wd2": w(ks[8], (256, NUM_DOMAINS)),   "bd2": w(ks[9], (1, NUM_DOMAINS)),
    }


def reference_forward_bf16(x, p):
    """Pure-JAX reference mirroring the kernel's bf16-operand / f32-accumulate matmuls."""
    bf, f32 = jnp.bfloat16, jnp.float32
    mm = lambda a, w: jnp.dot(a.astype(bf), w.astype(bf), preferred_element_type=f32)
    h1 = jnp.maximum(mm(x, p["w1"]) + p["b1"], 0.0)
    h2 = jnp.maximum(mm(h1, p["w2"]) + p["b2"], 0.0)
    ew = jax.nn.softmax(mm(h2, p["w3"]) + p["b3"], axis=-1)
    hd = jnp.maximum(mm(x, p["wd1"]) + p["bd1"], 0.0)
    dp = jax.nn.softmax(mm(hd, p["wd2"]) + p["bd2"], axis=-1)
    return ew, dp


def reference_forward_f32(x, p):
    """Original full-f32 module semantics (loose fidelity check)."""
    h1 = jnp.maximum(x @ p["w1"] + p["b1"], 0.0)
    h2 = jnp.maximum(h1 @ p["w2"] + p["b2"], 0.0)
    ew = jax.nn.softmax(h2 @ p["w3"] + p["b3"], axis=-1)
    hd = jnp.maximum(x @ p["wd1"] + p["bd1"], 0.0)
    dp = jax.nn.softmax(hd @ p["wd2"] + p["bd2"], axis=-1)
    return ew, dp


if __name__ == "__main__":
    key = jax.random.PRNGKey(0)
    k_x, k_p = jax.random.split(key)

    batch = 8
    embedding_dim = 768   # fixed by the module
    num_experts = 16

    x = jax.random.normal(k_x, (batch, embedding_dim), dtype=jnp.float32)
    params = init_params(k_p, embedding_dim, num_experts)
    prep = prepare_params(params)

    expert_weights, domain_probs = domain_router_forward(x, prep)
    jax.block_until_ready((expert_weights, domain_probs))

    assert expert_weights.shape == (batch, num_experts)
    assert domain_probs.shape == (batch, NUM_DOMAINS)

    # Tight check against a reference that uses the same bf16 matmul operands.
    ew_ref, dp_ref = reference_forward_bf16(x, params)
    assert jnp.allclose(expert_weights, ew_ref, atol=2e-4, rtol=2e-4)
    assert jnp.allclose(domain_probs, dp_ref, atol=2e-4, rtol=2e-4)

    # Loose check against the original all-f32 module semantics.
    ew_f32, dp_f32 = reference_forward_f32(x, params)
    assert jnp.allclose(expert_weights, ew_f32, atol=5e-3)
    assert jnp.allclose(domain_probs, dp_f32, atol=5e-3)

    # Probabilities sum to 1 (exact softmax normalization; padded lanes are exactly 0).
    assert jnp.allclose(jnp.sum(expert_weights, axis=-1), 1.0, atol=1e-5)
    assert jnp.allclose(jnp.sum(domain_probs, axis=-1), 1.0, atol=1e-5)

    print("KERNEL_OK")
</pallas_src>

<mosaic_0001>
module attributes {stable_mosaic.version = 11 : i64} {
  func.func @domain_router_kernel(%arg0: i32, %arg1: memref<8x768xf32, #tpu.memory_space<vmem>>, %arg2: memref<768x768xbf16, #tpu.memory_space<vmem>>, %arg3: memref<1x768xf32, #tpu.memory_space<vmem>>, %arg4: memref<512x256xbf16, #tpu.memory_space<vmem>>, %arg5: memref<1x256xf32, #tpu.memory_space<vmem>>, %arg6: memref<256x128xbf16, #tpu.memory_space<vmem>>, %arg7: memref<1x128xf32, #tpu.memory_space<vmem>>, %arg8: memref<256x128xbf16, #tpu.memory_space<vmem>>, %arg9: memref<1x128xf32, #tpu.memory_space<vmem>>, %arg10: memref<8x128xf32, #tpu.memory_space<vmem>>) attributes {dimension_semantics = [#tpu.dimension_semantics<arbitrary>], iteration_bounds = array<i64: 1>, scalar_prefetch = 0 : i64, scratch_operands = 0 : i64, tpu.core_type = #tpu.core_type<tc>, window_params = [{transform_indices = @transform_0, window_bounds = array<i64: 8, 768>}, {pipeline_mode = #tpu.pipeline_mode<synchronous>, transform_indices = @transform_1, window_bounds = array<i64: 768, 768>}, {pipeline_mode = #tpu.pipeline_mode<synchronous>, transform_indices = @transform_2, window_bounds = array<i64: 1, 768>}, {pipeline_mode = #tpu.pipeline_mode<synchronous>, transform_indices = @transform_3, window_bounds = array<i64: 512, 256>}, {pipeline_mode = #tpu.pipeline_mode<synchronous>, transform_indices = @transform_4, window_bounds = array<i64: 1, 256>}, {pipeline_mode = #tpu.pipeline_mode<synchronous>, transform_indices = @transform_5, window_bounds = array<i64: 256, 128>}, {pipeline_mode = #tpu.pipeline_mode<synchronous>, transform_indices = @transform_6, window_bounds = array<i64: 1, 128>}, {pipeline_mode = #tpu.pipeline_mode<synchronous>, transform_indices = @transform_7, window_bounds = array<i64: 256, 128>}, {pipeline_mode = #tpu.pipeline_mode<synchronous>, transform_indices = @transform_8, window_bounds = array<i64: 1, 128>}, {transform_indices = @transform_9, window_bounds = array<i64: 8, 128>}]} {
    %c0 = arith.constant 0 : index
    %c0_0 = arith.constant 0 : index
    %0 = vector.load %arg1[%c0, %c0_0] : memref<8x768xf32, #tpu.memory_space<vmem>>, vector<8x768xf32>
    %1 = arith.truncf %0 : vector<8x768xf32> to vector<8x768xbf16>
    %c0_1 = arith.constant 0 : index
    %c0_2 = arith.constant 0 : index
    %2 = vector.load %arg2[%c0_1, %c0_2] : memref<768x768xbf16, #tpu.memory_space<vmem>>, vector<768x768xbf16>
    %cst = arith.constant dense<0.000000e+00> : vector<8x768xf32>
    %3 = tpu.matmul %1, %2, %cst {dimension_numbers = #tpu.dot_dimension_numbers<[1], [0], [0], [1], [0, 0, 1, 1], [], []>} : vector<8x768xbf16>, vector<768x768xbf16>, vector<8x768xf32> -> vector<8x768xf32>
    %c0_3 = arith.constant 0 : index
    %c0_4 = arith.constant 0 : index
    %4 = vector.load %arg3[%c0_3, %c0_4] : memref<1x768xf32, #tpu.memory_space<vmem>>, vector<1x768xf32>
    %5 = vector.broadcast %4 : vector<1x768xf32> to vector<8x768xf32>
    %6 = arith.addf %3, %5 : vector<8x768xf32>
    %cst_5 = arith.constant 0.000000e+00 : f32
    %7 = vector.broadcast %cst_5 : f32 to vector<8x768xf32>
    %8 = arith.maximumf %6, %7 : vector<8x768xf32>
    %9 = vector.extract_strided_slice %8 {offsets = [0, 0], sizes = [8, 512], strides = [1, 1]} : vector<8x768xf32> to vector<8x512xf32>
    %10 = arith.truncf %9 : vector<8x512xf32> to vector<8x512xbf16>
    %11 = vector.extract_strided_slice %8 {offsets = [0, 512], sizes = [8, 256], strides = [1, 1]} : vector<8x768xf32> to vector<8x256xf32>
    %12 = arith.truncf %11 : vector<8x256xf32> to vector<8x256xbf16>
    %c0_6 = arith.constant 0 : index
    %c0_7 = arith.constant 0 : index
    %13 = vector.load %arg4[%c0_6, %c0_7] : memref<512x256xbf16, #tpu.memory_space<vmem>>, vector<512x256xbf16>
    %cst_8 = arith.constant dense<0.000000e+00> : vector<8x256xf32>
    %14 = tpu.matmul %10, %13, %cst_8 {dimension_numbers = #tpu.dot_dimension_numbers<[1], [0], [0], [1], [0, 0, 1, 1], [], []>} : vector<8x512xbf16>, vector<512x256xbf16>, vector<8x256xf32> -> vector<8x256xf32>
    %c0_9 = arith.constant 0 : index
    %c0_10 = arith.constant 0 : index
    %15 = vector.load %arg5[%c0_9, %c0_10] : memref<1x256xf32, #tpu.memory_space<vmem>>, vector<1x256xf32>
    %16 = vector.broadcast %15 : vector<1x256xf32> to vector<8x256xf32>
    %17 = arith.addf %14, %16 : vector<8x256xf32>
    %cst_11 = arith.constant 0.000000e+00 : f32
    %18 = vector.broadcast %cst_11 : f32 to vector<8x256xf32>
    %19 = arith.maximumf %17, %18 : vector<8x256xf32>
    %20 = arith.truncf %19 : vector<8x256xf32> to vector<8x256xbf16>
    %c0_12 = arith.constant 0 : index
    %c0_13 = arith.constant 0 : index
    %21 = vector.load %arg6[%c0_12, %c0_13] : memref<256x128xbf16, #tpu.memory_space<vmem>>, vector<256x128xbf16>
    %cst_14 = arith.constant dense<0.000000e+00> : vector<8x128xf32>
    %22 = tpu.matmul %20, %21, %cst_14 {dimension_numbers = #tpu.dot_dimension_numbers<[1], [0], [0], [1], [0, 0, 1, 1], [], []>} : vector<8x256xbf16>, vector<256x128xbf16>, vector<8x128xf32> -> vector<8x128xf32>
    %c0_15 = arith.constant 0 : index
    %c0_16 = arith.constant 0 : index
    %23 = vector.load %arg7[%c0_15, %c0_16] : memref<1x128xf32, #tpu.memory_space<vmem>>, vector<1x128xf32>
    %24 = vector.broadcast %23 : vector<1x128xf32> to vector<8x128xf32>
    %25 = arith.addf %22, %24 : vector<8x128xf32>
    %c0_17 = arith.constant 0 : index
    %c0_18 = arith.constant 0 : index
    %26 = vector.load %arg8[%c0_17, %c0_18] : memref<256x128xbf16, #tpu.memory_space<vmem>>, vector<256x128xbf16>
    %cst_19 = arith.constant dense<0.000000e+00> : vector<8x128xf32>
    %27 = tpu.matmul %12, %26, %cst_19 {dimension_numbers = #tpu.dot_dimension_numbers<[1], [0], [0], [1], [0, 0, 1, 1], [], []>} : vector<8x256xbf16>, vector<256x128xbf16>, vector<8x128xf32> -> vector<8x128xf32>
    %c0_20 = arith.constant 0 : index
    %c0_21 = arith.constant 0 : index
    %28 = vector.load %arg9[%c0_20, %c0_21] : memref<1x128xf32, #tpu.memory_space<vmem>>, vector<1x128xf32>
    %29 = vector.broadcast %28 : vector<1x128xf32> to vector<8x128xf32>
    %30 = arith.addf %27, %29 : vector<8x128xf32>
    %cst_22 = arith.constant dense<0xFF800000> : vector<8xf32>
    %31 = vector.multi_reduction <maximumf>, %25, %cst_22 [1] : vector<8x128xf32> to vector<8xf32>
    %32 = vector.shape_cast %31 : vector<8xf32> to vector<8x1xf32>
    %33 = vector.broadcast %32 : vector<8x1xf32> to vector<8x128xf32>
    %34 = arith.subf %25, %33 : vector<8x128xf32>
    %35 = math.exp %34 : vector<8x128xf32>
    %cst_23 = arith.constant dense<0.000000e+00> : vector<8xf32>
    %36 = vector.multi_reduction <add>, %35, %cst_23 [1] : vector<8x128xf32> to vector<8xf32>
    %37 = vector.shape_cast %36 : vector<8xf32> to vector<8x1xf32>
    %38 = vector.broadcast %37 : vector<8x1xf32> to vector<8x128xf32>
    %39 = arith.divf %35, %38 : vector<8x128xf32>
    %cst_24 = arith.constant dense<0xFF800000> : vector<8xf32>
    %40 = vector.multi_reduction <maximumf>, %30, %cst_24 [1] : vector<8x128xf32> to vector<8xf32>
    %41 = vector.shape_cast %40 : vector<8xf32> to vector<8x1xf32>
    %42 = vector.broadcast %41 : vector<8x1xf32> to vector<8x128xf32>
    %43 = arith.subf %30, %42 : vector<8x128xf32>
    %44 = math.exp %43 : vector<8x128xf32>
    %cst_25 = arith.constant dense<0.000000e+00> : vector<8xf32>
    %45 = vector.multi_reduction <add>, %44, %cst_25 [1] : vector<8x128xf32> to vector<8xf32>
    %46 = vector.shape_cast %45 : vector<8xf32> to vector<8x1xf32>
    %47 = vector.broadcast %46 : vector<8x1xf32> to vector<8x128xf32>
    %48 = arith.divf %44, %47 : vector<8x128xf32>
    %49 = arith.addf %39, %48 : vector<8x128xf32>
    %c0_26 = arith.constant 0 : index
    %c0_27 = arith.constant 0 : index
    %50 = vector.load %arg10[%c0_26, %c0_27] : memref<8x128xf32, #tpu.memory_space<vmem>>, vector<8x128xf32>
    tpu.vector_store %arg10[%c0_26, %c0_27], %49 {strides = array<i32>} : memref<8x128xf32, #tpu.memory_space<vmem>>, vector<8x128xf32>,
    return
  }
  func.func @transform_0(%arg0: i32) -> (i32, i32) {
    %c0_i32 = arith.constant 0 : i32
    %c0_i32_0 = arith.constant 0 : i32
    return %arg0, %c0_i32 : i32, i32
  }
  func.func @transform_1(%arg0: i32) -> (i32, i32) {
    %c0_i32 = arith.constant 0 : i32
    %c0_i32_0 = arith.constant 0 : i32
    %c0_i32_1 = arith.constant 0 : i32
    return %c0_i32, %c0_i32_0 : i32, i32
  }
  func.func @transform_2(%arg0: i32) -> (i32, i32) {
    %c0_i32 = arith.constant 0 : i32
    %c0_i32_0 = arith.constant 0 : i32
    %c0_i32_1 = arith.constant 0 : i32
    return %c0_i32, %c0_i32_0 : i32, i32
  }
  func.func @transform_3(%arg0: i32) -> (i32, i32) {
    %c0_i32 = arith.constant 0 : i32
    %c0_i32_0 = arith.constant 0 : i32
    %c0_i32_1 = arith.constant 0 : i32
    return %c0_i32, %c0_i32_0 : i32, i32
  }
  func.func @transform_4(%arg0: i32) -> (i32, i32) {
    %c0_i32 = arith.constant 0 : i32
    %c0_i32_0 = arith.constant 0 : i32
    %c0_i32_1 = arith.constant 0 : i32
    return %c0_i32, %c0_i32_0 : i32, i32
  }
  func.func @transform_5(%arg0: i32) -> (i32, i32) {
    %c0_i32 = arith.constant 0 : i32
    %c0_i32_0 = arith.constant 0 : i32
    %c0_i32_1 = arith.constant 0 : i32
    return %c0_i32, %c0_i32_0 : i32, i32
  }
  func.func @transform_6(%arg0: i32) -> (i32, i32) {
    %c0_i32 = arith.constant 0 : i32
    %c0_i32_0 = arith.constant 0 : i32
    %c0_i32_1 = arith.constant 0 : i32
    return %c0_i32, %c0_i32_0 : i32, i32
  }
  func.func @transform_7(%arg0: i32) -> (i32, i32) {
    %c0_i32 = arith.constant 0 : i32
    %c0_i32_0 = arith.constant 0 : i32
    %c0_i32_1 = arith.constant 0 : i32
    return %c0_i32, %c0_i32_0 : i32, i32
  }
  func.func @transform_8(%arg0: i32) -> (i32, i32) {
    %c0_i32 = arith.constant 0 : i32
    %c0_i32_0 = arith.constant 0 : i32
    %c0_i32_1 = arith.constant 0 : i32
    return %c0_i32, %c0_i32_0 : i32, i32
  }
  func.func @transform_9(%arg0: i32) -> (i32, i32) {
    %c0_i32 = arith.constant 0 : i32
    %c0_i32_0 = arith.constant 0 : i32
    return %arg0, %c0_i32 : i32, i32
  }
}

</mosaic_0001>

<bundles_post_ra>
// kernel: tpu_custom_call.1
= control target key start
LH: loop header
LB: loop body
LE: loop exit
PB: predicated region body
PF: predicated region fallthrough
CT: control target
= control target key end

     0   :  { %14 = vsyncpa [#allocation3], 0  ;;  %s4564_s0 = inlined_call_operand.hbm [shape: f32[8,768], index: 0, kind: input, shape index: {}]   ;;  %s4565_s1 = inlined_call_operand.hbm [shape: bf16[768,768], index: 1, kind: input, shape index: {}]   ;;  %s4566_s2 = inlined_call_operand.hbm [shape: f32[1,768], index: 2, kind: input, shape index: {}]   ;;  %s4567_s3 = inlined_call_operand.hbm [shape: bf16[512,256], index: 3, kind: input, shape index: {}]   ;;  %s4568_s4 = inlined_call_operand.hbm [shape: f32[1,256], index: 4, kind: input, shape index: {}]   ;;  %s4569_s5 = inlined_call_operand.hbm [shape: bf16[256,128], index: 5, kind: input, shape index: {}]   ;;  %s4570_s6 = inlined_call_operand.hbm [shape: f32[1,128], index: 6, kind: input, shape index: {}]   ;;  %s4571_s7 = inlined_call_operand.hbm [shape: bf16[256,128], index: 7, kind: input, shape index: {}]   ;;  %s4572_s8 = inlined_call_operand.hbm [shape: f32[1,128], index: 8, kind: input, shape index: {}]   ;;  %s4573_s9 = inlined_call_operand.hbm [shape: f32[8,128], index: 9, kind: output, shape index: {}]  }
   0x1   :  { %15 = vsyncpa [#allocation6], 0 }
   0x2   :  { %16 = vsyncpa [#allocation9], 0 }
   0x3   :  { %17 = vsyncpa [#allocation12], 0 }
   0x4   :  { %18 = vsyncpa [#allocation15], 0 }
   0x5   :  { %19 = vsyncpa [#allocation4], 0  ;;  %s4396_s30 = smov [#allocation5]  }
   0x6   :  { %s35_s10 = sshll.u32 %s4396_s30, 4  ;;  %s36_s10 = int_to_ptr.vmem [resolvable:$true] %s35_s10 }
   0x7   :  { %s4192_s11 = scalar_lea.vmem %s36_s10, 36864  ;;  %p4197_p1 = scmp.lt.s32.totalorder %s36_s10, %s36_s10 }
   0x8   :  { %p4193_p0 = scmp.ne.s32.totalorder %s36_s10, %s4192_s11  ;;  %p4198_p2 = scmp.lt.s32.totalorder %s4192_s11, %s4192_s11 }
   0xa   :  { %p4199_p3 = por %p4198_p2, %p4197_p1 }
   0xc   :  { %p4200_p4 = pnand %p4199_p3, %p4193_p0 }
   0xe   :  { %4203 = shalt.err (!%p4200_p4)
}
   0xf   :  { %s4397_s12 = smov 384   ;;  %s4398_s13 = smov 24  }
  0x10   :  { %41 = dma.hbm_to_vmem [thread:$0]  %s4565_s1, 36864, %s36_s10, [#allocation6], %s4397_s12, %s4397_s12, %s4398_s13  }
  0x11   :  { %s4399_s16 = smov [#allocation8]  }
  0x12   :  { %s57_s17 = sshll.u32 %s4399_s16, 4  ;;  %s58_s17 = int_to_ptr.vmem [resolvable:$true] %s57_s17 }
  0x13   :  { %s4212_s18 = scalar_lea.vmem %s58_s17, 8192  ;;  %p4217_p6 = scmp.lt.s32.totalorder %s58_s17, %s58_s17 }
  0x14   :  { %p4213_p5 = scmp.ne.s32.totalorder %s58_s17, %s4212_s18  ;;  %p4218_p7 = scmp.lt.s32.totalorder %s4212_s18, %s4212_s18 }
  0x16   :  { %p4219_p8 = por %p4218_p7, %p4217_p6 }
  0x18   :  { %p4220_p9 = pnand %p4219_p8, %p4213_p5 }
  0x1a   :  { %4223 = shalt.err (!%p4220_p9)
}
  0x1b   :  { %s4400_s19 = smov 128   ;;  %s4401_s20 = smov 8  }
  0x1c   :  { %63 = dma.hbm_to_vmem [thread:$0]  %s4567_s3, 8192, %s58_s17, [#allocation9], %s4400_s19, %s4400_s19, %s4401_s20  }
  0x1d   :  { %s4402_s23 = smov [#allocation11]  }
  0x1e   :  { %s79_s24 = sshll.u32 %s4402_s23, 4  ;;  %s80_s24 = int_to_ptr.vmem [resolvable:$true] %s79_s24 }
  0x1f   :  { %s4232_s1 = scalar_lea.vmem %s80_s24, 2048  ;;  %p4237_p11 = scmp.lt.s32.totalorder %s80_s24, %s80_s24 }
  0x20   :  { %p4233_p10 = scmp.ne.s32.totalorder %s80_s24, %s4232_s1  ;;  %p4238_p12 = scmp.lt.s32.totalorder %s4232_s1, %s4232_s1 }
  0x22   :  { %p4239_p13 = por %p4238_p12, %p4237_p11 }
  0x24   :  { %p4240_p0 = pnand %p4239_p13, %p4233_p10 }
  0x26   :  { %4243 = shalt.err (!%p4240_p0)
}
  0x27   :  { %s4403_s25 = smov 64   ;;  %s4404_s26 = smov 4  }
  0x28   :  { %85 = dma.hbm_to_vmem [thread:$0]  %s4569_s5, 2048, %s80_s24, [#allocation12], %s4403_s25, %s4403_s25, %s4404_s26  }
  0x29   :  { %s4405_s29 = smov [#allocation14]   ;;  %s4406_s3 = smov [#allocation2]  }
  0x2a   :  { %s101_s30 = sshll.u32 %s4405_s29, 4  ;;  %s26_s10 = sshll.u32 %s4406_s3, 4  ;;  %s102_s30 = int_to_ptr.vmem [resolvable:$true] %s101_s30  ;;  %s27_s10 = int_to_ptr.vmem [resolvable:$true] %s26_s10 }
  0x2b   :  { %s4252_s11 = scalar_lea.vmem %s102_s30, 2048  ;;  %p4257_p2 = scmp.lt.s32.totalorder %s102_s30, %s102_s30 }
  0x2c   :  { %p4253_p1 = scmp.ne.s32.totalorder %s102_s30, %s4252_s11  ;;  %p4258_p3 = scmp.lt.s32.totalorder %s4252_s11, %s4252_s11 }
  0x2e   :  { %p4259_p4 = por %p4258_p3, %p4257_p2 }
  0x30   :  { %p4260_p5 = pnand %p4259_p4, %p4253_p1 }
  0x32   :  { %4263 = shalt.err (!%p4260_p5)
}
  0x33   :  { %107 = dma.hbm_to_vmem [thread:$0]  %s4571_s7, 2048, %s102_s30, [#allocation15], %s4403_s25, %s4403_s25, %s4404_s26  }
  0x34   :  { %s4272_s14 = scalar_lea.vmem %s27_s10, 768  ;;  %p4277_p7 = scmp.lt.s32.totalorder %s27_s10, %s27_s10 }
  0x35   :  { %p4273_p6 = scmp.ne.s32.totalorder %s27_s10, %s4272_s14  ;;  %p4278_p8 = scmp.lt.s32.totalorder %s4272_s14, %s4272_s14 }
  0x37   :  { %p4279_p9 = por %p4278_p8, %p4277_p7 }
  0x39   :  { %p4280_p10 = pnand %p4279_p9, %p4273_p6 }
  0x3b   :  { %4283 = shalt.err (!%p4280_p10)
}
  0x3c   :  { %29 = dma.hbm_to_vmem [thread:$0]  %s4564_s0, 768, %s27_s10, [#allocation3]  }
  0x3d   :  { %s4407_s16 = smov [#allocation7]   ;;  %s4408_s18 = smov [#allocation10]  }
  0x3e   :  { %s48_s17 = sshll.u32 %s4407_s16, 4  ;;  %s70_s19 = sshll.u32 %s4408_s18, 4  ;;  %s49_s17 = int_to_ptr.vmem [resolvable:$true] %s48_s17  ;;  %s71_s19 = int_to_ptr.vmem [resolvable:$true] %s70_s19 }
  0x3f   :  { %s4292_s20 = scalar_lea.vmem %s49_s17, 96  ;;  %p4297_p12 = scmp.lt.s32.totalorder %s49_s17, %s49_s17 }
  0x40   :  { %p4293_p11 = scmp.ne.s32.totalorder %s49_s17, %s4292_s20  ;;  %p4298_p13 = scmp.lt.s32.totalorder %s4292_s20, %s4292_s20 }
  0x42   :  { %p4299_p0 = por %p4298_p13, %p4297_p12 }
  0x44   :  { %p4300_p1 = pnand %p4299_p0, %p4293_p11 }
  0x46   :  { %4303 = shalt.err (!%p4300_p1)
}
  0x47   :  { %51 = dma.hbm_to_vmem [thread:$0]  %s4566_s2, 96, %s49_s17, [#allocation6]  }
  0x48   :  { %s4312_s22 = scalar_lea.vmem %s71_s19, 32  ;;  %p4317_p3 = scmp.lt.s32.totalorder %s71_s19, %s71_s19 }
  0x49   :  { %p4313_p2 = scmp.ne.s32.totalorder %s71_s19, %s4312_s22  ;;  %p4318_p4 = scmp.lt.s32.totalorder %s4312_s22, %s4312_s22 }
  0x4b   :  { %p4319_p5 = por %p4318_p4, %p4317_p3 }
  0x4d   :  { %p4320_p6 = pnand %p4319_p5, %p4313_p2 }
  0x4f   :  { %4323 = shalt.err (!%p4320_p6)
}
  0x50   :  { %73 = dma.hbm_to_vmem [thread:$0]  %s4568_s4, 32, %s71_s19, [#allocation9]  }
  0x51   :  { %s4409_s24 = smov [#allocation13]   ;;  %s4410_s25 = smov [#allocation16]  }
  0x52   :  { %s92_s1 = sshll.u32 %s4409_s24, 4  ;;  %s114_s26 = sshll.u32 %s4410_s25, 4  ;;  %s93_s1 = int_to_ptr.vmem [resolvable:$true] %s92_s1  ;;  %s115_s26 = int_to_ptr.vmem [resolvable:$true] %s114_s26 }
  0x53   :  { %s4332_s27 = scalar_lea.vmem %s93_s1, 16  ;;  %s4336_s2 = scalar_lea.vmem %s93_s1, 32 }
  0x54   :  { %p4333_p7 = scmp.ne.s32.totalorder %s93_s1, %s4332_s27  ;;  %p4337_p8 = scmp.lt.s32.totalorder %s93_s1, %s93_s1 }
  0x55   :  { %p4338_p9 = scmp.lt.s32.totalorder %s4336_s2, %s4332_s27 }
  0x57   :  { %p4339_p10 = por %p4338_p9, %p4337_p8 }
  0x59   :  { %p4340_p11 = pnand %p4339_p10, %p4333_p7 }
  0x5b   :  { %4343 = shalt.err (!%p4340_p11)
}
  0x5c   :  { %95 = dma.hbm_to_vmem [thread:$0]  %s4570_s6, 16, %s93_s1, [#allocation12]  }
  0x5d   :  { %s4352_s30 = scalar_lea.vmem %s115_s26, 16  ;;  %s4356_s4 = scalar_lea.vmem %s115_s26, 32 }
  0x5e   :  { %p4353_p12 = scmp.ne.s32.totalorder %s115_s26, %s4352_s30  ;;  %p4357_p13 = scmp.lt.s32.totalorder %s115_s26, %s115_s26 }
  0x5f   :  { %p4358_p0 = scmp.lt.s32.totalorder %s4356_s4, %s4352_s30 }
  0x61   :  { %p4359_p1 = por %p4358_p0, %p4357_p13 }
  0x63   :  { %p4360_p2 = pnand %p4359_p1, %p4353_p12 }
  0x65   :  { %4363 = shalt.err (!%p4360_p2)
}
  0x66   :  { %117 = dma.hbm_to_vmem [thread:$0]  %s4572_s8, 16, %s115_s26, [#allocation15]  }
  0x67   :  { %4384 = dma.done.wait [#allocation3], 768  }
  0x68   :  { %4385 = vsyncadd [#allocation3], 4294966528 }
  0x69   :  { %4386 = dma.done.wait [#allocation6], 36960  }
  0x6a   :  { %4387 = vsyncadd [#allocation6], 4294930336 }
  0x6b   :  { %4388 = dma.done.wait [#allocation9], 8224  }
  0x6c   :  { %4389 = vsyncadd [#allocation9], 4294959072 }
  0x6d   :  { %4390 = dma.done.wait [#allocation12], 2064  }
  0x6e   :  { %4391 = vsyncadd [#allocation12], 4294965232 }
  0x6f   :  { %4392 = dma.done.wait [#allocation15], 2064  }
  0x70   :  { %4393 = vsyncadd [#allocation15], 4294965232  ;;  %v3616_v0 = vld [vmem:[#allocation5 + $0x154] ss:$24 sps:$4 sm:$0xff]   ;;  %v3620_v2 = vld [vmem:[#allocation5 + $0x150] ss:$24 sps:$4 sm:$0xff]  }
  0x71   :  { %v3618_v1 = vld [vmem:[#allocation5 + $0x454] ss:$24 sps:$4 sm:$0xff]   ;;  %1918 = vmatprep.subr.bf16.mxu0 %v3616_v0  ;;  %v3621_v3 = vld [vmem:[#allocation5 + $0x450] ss:$24 sps:$4 sm:$0xff]   ;;  %v3622_v4 = vld [vmem:[#allocation5 + $0x124] ss:$24 sps:$4 sm:$0xff]  }
  0x72   :  { %1959 = vmatprep.subr.bf16.mxu1 %v3618_v1  ;;  %1919 = vmatpush1.bf16.msra.mxu0 %v3620_v2  ;;  %v3624_v5 = vld [vmem:[#allocation5 + $0x424] ss:$24 sps:$4 sm:$0xff]   ;;  %v3626_v6 = vld [vmem:[#allocation5 + $0x120] ss:$24 sps:$4 sm:$0xff]   ;;  %v3628_v8 = vld [vmem:[#allocation5 + $0xf4] ss:$24 sps:$4 sm:$0xff]  }
  0x73   :  { %1960 = vmatpush1.bf16.msra.mxu1 %v3621_v3  ;;  %1920 = vmatprep.subr.bf16.mxu0 %v3622_v4  ;;  %v3627_v7 = vld [vmem:[#allocation5 + $0x420] ss:$24 sps:$4 sm:$0xff]   ;;  %v3630_v9 = vld [vmem:[#allocation5 + $0x3f4] ss:$24 sps:$4 sm:$0xff]   ;;  %v3632_v10 = vld [vmem:[#allocation5 + $0xf0] ss:$24 sps:$4 sm:$0xff]  }
  0x74   :  { %1961 = vmatprep.subr.bf16.mxu1 %v3624_v5  ;;  %v3633_v11 = vld [vmem:[#allocation5 + $0x3f0] ss:$24 sps:$4 sm:$0xff]   ;;  %v3634_v12 = vld [vmem:[#allocation5 + $0xc4] ss:$24 sps:$4 sm:$0xff]   ;;  %v3638_v14 = vld [vmem:[#allocation5 + $0xc0] ss:$24 sps:$4 sm:$0xff]  }
  0x75   :  { %v3636_v13 = vld [vmem:[#allocation5 + $0x3c4] ss:$24 sps:$4 sm:$0xff]   ;;  %v3639_v15 = vld [vmem:[#allocation5 + $0x3c0] ss:$24 sps:$4 sm:$0xff]   ;;  %v3640_v16 = vld [vmem:[#allocation5 + $0x94] ss:$24 sps:$4 sm:$0xff]  }
  0x76   :  { %1921 = vmatpush1.bf16.msra.mxu0 %v3626_v6  ;;  %v3642_v17 = vld [vmem:[#allocation5 + $0x394] ss:$24 sps:$4 sm:$0xff]   ;;  %v3644_v18 = vld [vmem:[#allocation5 + $0x90] ss:$24 sps:$4 sm:$0xff]   ;;  %v3646_v20 = vld [vmem:[#allocation5 + $0x64] ss:$24 sps:$4 sm:$0xff]  }
  0x77   :  { %1962 = vmatpush1.bf16.msra.mxu1 %v3627_v7  ;;  %1922 = vmatprep.subr.bf16.mxu0 %v3628_v8  ;;  %v3645_v19 = vld [vmem:[#allocation5 + $0x390] ss:$24 sps:$4 sm:$0xff]   ;;  %v3648_v21 = vld [vmem:[#allocation5 + $0x364] ss:$24 sps:$4 sm:$0xff]   ;;  %v3650_v22 = vld [vmem:[#allocation5 + $0x60] ss:$24 sps:$4 sm:$0xff]  }
  0x78   :  { %1963 = vmatprep.subr.bf16.mxu1 %v3630_v9  ;;  %v3651_v23 = vld [vmem:[#allocation5 + $0x360] ss:$24 sps:$4 sm:$0xff]   ;;  %v3652_v24 = vld [vmem:[#allocation5 + $0x34] ss:$24 sps:$4 sm:$0xff]   ;;  %v3656_v26 = vld [vmem:[#allocation5 + $0x30] ss:$24 sps:$4 sm:$0xff]  }
  0x79   :  { %v3654_v25 = vld [vmem:[#allocation5 + $0x334] ss:$24 sps:$4 sm:$0xff]   ;;  %v3657_v27 = vld [vmem:[#allocation5 + $0x330] ss:$24 sps:$4 sm:$0xff]   ;;  %v3658_v28 = vld [vmem:[#allocation5 + $0x4] ss:$24 sps:$4 sm:$0xff]  }
  0x7a   :  { %1923 = vmatpush1.bf16.msra.mxu0 %v3632_v10  ;;  %v3660_v29 = vld [vmem:[#allocation5 + $0x304] ss:$24 sps:$4 sm:$0xff]   ;;  %v3662_v30 = vld [vmem:[#allocation5] ss:$24 sps:$4 sm:$0xff]   ;;  %v3664_v32 = vld [vmem:[#allocation5 + $0x2d4] ss:$24 sps:$4 sm:$0xff]  }
  0x7b   :  { %1964 = vmatpush1.bf16.msra.mxu1 %v3633_v11  ;;  %1924 = vmatprep.subr.bf16.mxu0 %v3634_v12  ;;  %v3663_v31 = vld [vmem:[#allocation5 + $0x300] ss:$24 sps:$4 sm:$0xff]   ;;  %v3666_v33 = vld [vmem:[#allocation5 + $0x5d4] ss:$24 sps:$4 sm:$0xff]   ;;  %v3668_v34 = vld [vmem:[#allocation5 + $0x2d0] ss:$24 sps:$4 sm:$0xff]  }
  0x7c   :  { %1965 = vmatprep.subr.bf16.mxu1 %v3636_v13  ;;  %v3669_v35 = vld [vmem:[#allocation5 + $0x5d0] ss:$24 sps:$4 sm:$0xff]   ;;  %v3670_v36 = vld [vmem:[#allocation5 + $0x2a4] ss:$24 sps:$4 sm:$0xff]   ;;  %v3674_v38 = vld [vmem:[#allocation5 + $0x2a0] ss:$24 sps:$4 sm:$0xff]  }
  0x7d   :  { %v3672_v37 = vld [vmem:[#allocation5 + $0x5a4] ss:$24 sps:$4 sm:$0xff]   ;;  %v3675_v39 = vld [vmem:[#allocation5 + $0x5a0] ss:$24 sps:$4 sm:$0xff]   ;;  %v3676_v40 = vld [vmem:[#allocation5 + $0x274] ss:$24 sps:$4 sm:$0xff]  }
  0x7e   :  { %1925 = vmatpush1.bf16.msra.mxu0 %v3638_v14  ;;  %v3678_v41 = vld [vmem:[#allocation5 + $0x574] ss:$24 sps:$4 sm:$0xff]   ;;  %v3680_v42 = vld [vmem:[#allocation5 + $0x270] ss:$24 sps:$4 sm:$0xff]   ;;  %v3682_v44 = vld [vmem:[#allocation5 + $0x244] ss:$24 sps:$4 sm:$0xff]  }
  0x7f   :  { %1966 = vmatpush1.bf16.msra.mxu1 %v3639_v15  ;;  %1926 = vmatprep.subr.bf16.mxu0 %v3640_v16  ;;  %v3681_v43 = vld [vmem:[#allocation5 + $0x570] ss:$24 sps:$4 sm:$0xff]   ;;  %v3684_v45 = vld [vmem:[#allocation5 + $0x544] ss:$24 sps:$4 sm:$0xff]   ;;  %v3686_v47 = vld [vmem:[#allocation5 + $0x240] ss:$24 sps:$4 sm:$0xff]  }
  0x80   :  { %1967 = vmatprep.subr.bf16.mxu1 %v3642_v17  ;;  %v147_v46 = vld [vmem:[#allocation2 + $0x8] sm:$0xff]  ;;  %v149_v50 = vld [vmem:[#allocation2 + $0x18] sm:$0xff]  ;;  %v146_v4 = vld [vmem:[#allocation2] sm:$0xff]  ;;  %s4411_s6 = smov [#allocation17]  }
  0x81   :  { %v3687_v48 = vld [vmem:[#allocation5 + $0x540] ss:$24 sps:$4 sm:$0xff]   ;;  %v4489_v49 = vpack.c.bf16 %v147_v46, %v147_v46  ;;  %v3688_v51 = vld [vmem:[#allocation5 + $0x214] ss:$24 sps:$4 sm:$0xff]   ;;  %v4491_v52 = vpack.c.bf16 %v149_v50, %v149_v50  ;;  %v3692_v54 = vld [vmem:[#allocation5 + $0x210] ss:$24 sps:$4 sm:$0xff]   ;;  %v4495_v8 = vpack.c.bf16 %v146_v4, %v146_v4 }
  0x82   :  { %1927 = vmatpush1.bf16.msra.mxu0 %v3644_v18  ;;  %v3690_v53 = vld [vmem:[#allocation5 + $0x514] ss:$24 sps:$4 sm:$0xff]   ;;  %v3693_v55 = vld [vmem:[#allocation5 + $0x510] ss:$24 sps:$4 sm:$0xff]   ;;  %v3694_v56 = vld [vmem:[#allocation5 + $0x1e4] ss:$24 sps:$4 sm:$0xff]  }
  0x83   :  { %1968 = vmatpush1.bf16.msra.mxu1 %v3645_v19  ;;  %1928 = vmatprep.subr.bf16.mxu0 %v3646_v20  ;;  %v3696_v57 = vld [vmem:[#allocation5 + $0x4e4] ss:$24 sps:$4 sm:$0xff]   ;;  %v3698_v58 = vld [vmem:[#allocation5 + $0x1e0] ss:$24 sps:$4 sm:$0xff]   ;;  %v3700_v60 = vld [vmem:[#allocation5 + $0x1b4] ss:$24 sps:$4 sm:$0xff]  }
  0x84   :  { %1969 = vmatprep.subr.bf16.mxu1 %v3648_v21  ;;  %1950 = vmatprep.mubr.bf16.mxu0 %v4489_v49  ;;  %v3699_v59 = vld [vmem:[#allocation5 + $0x4e0] ss:$24 sps:$4 sm:$0xff]   ;;  %v3702_v61 = vld [vmem:[#allocation5 + $0x4b4] ss:$24 sps:$4 sm:$0xff]   ;;  %v3704_v62 = vld [vmem:[#allocation5 + $0x1b0] ss:$24 sps:$4 sm:$0xff]  }
  0x85   :  { %1991 = vmatprep.mubr.bf16.mxu1 %v4491_v52  ;;  %v3705_v63 = vld [vmem:[#allocation5 + $0x4b0] ss:$24 sps:$4 sm:$0xff]   ;;  %v3706_v0 = vld [vmem:[#allocation5 + $0x184] ss:$24 sps:$4 sm:$0xff]   ;;  %v3710_v2 = vld [vmem:[#allocation5 + $0x180] ss:$24 sps:$4 sm:$0xff]  }
  0x86   :  { %1929 = vmatpush1.bf16.msra.mxu0 %v3650_v22  ;;  %v3708_v1 = vld [vmem:[#allocation5 + $0x484] ss:$24 sps:$4 sm:$0xff]   ;;  %v3711_v3 = vld [vmem:[#allocation5 + $0x480] ss:$24 sps:$4 sm:$0xff]   ;;  %v3714_v6 = vld [vmem:[#allocation5 + $0x754] ss:$24 sps:$4 sm:$0xff]  }
  0x87   :  { %1970 = vmatpush1.bf16.msra.mxu1 %v3651_v23  ;;  %1930 = vmatprep.subr.bf16.mxu0 %v3652_v24  ;;  %v148_v5 = vld [vmem:[#allocation2 + $0x10] sm:$0xff]  ;;  %v3717_v7 = vld [vmem:[#allocation5 + $0x15c] ss:$24 sps:$4 sm:$0xff]   ;;  %v3712_v10 = vld [vmem:[#allocation5 + $0x750] ss:$24 sps:$4 sm:$0xff]   ;;  %s3157_s8 = sshll.u32 %s4411_s6, 4  ;;  %s3158_s8 = int_to_ptr.vmem [resolvable:$true] %s3157_s8 }
  0x88   :  { %1971 = vmatprep.subr.bf16.mxu1 %v3654_v25  ;;  %v4497_v9 = vpack.c.bf16 %v148_v5, %v148_v5  ;;  %v3715_v11 = vld [vmem:[#allocation5 + $0x158] ss:$24 sps:$4 sm:$0xff]   ;;  %v3720_v12 = vld [vmem:[#allocation5 + $0x724] ss:$24 sps:$4 sm:$0xff]   ;;  %v3721_v15 = vld [vmem:[#allocation5 + $0x128] ss:$24 sps:$4 sm:$0xff]   ;;  %p4369_p4 = scmp.lt.s32.totalorder %s3158_s8, %s3158_s8 }
  0x89   :  { %v3723_v13 = vld [vmem:[#allocation5 + $0x12c] ss:$24 sps:$4 sm:$0xff]   ;;  %v3718_v14 = vld [vmem:[#allocation5 + $0x720] ss:$24 sps:$4 sm:$0xff]   ;;  %v3729_v17 = vld [vmem:[#allocation5 + $0xfc] ss:$24 sps:$4 sm:$0xff]  }
  0x8a   :  { %1931 = vmatpush1.bf16.msra.mxu0 %v3656_v26  ;;  %v3726_v16 = vld [vmem:[#allocation5 + $0x6f4] ss:$24 sps:$4 sm:$0xff]   ;;  %v3724_v18 = vld [vmem:[#allocation5 + $0x6f0] ss:$24 sps:$4 sm:$0xff]   ;;  %v3732_v20 = vld [vmem:[#allocation5 + $0x6c4] ss:$24 sps:$4 sm:$0xff]  }
  0x8b   :  { %1972 = vmatpush1.bf16.msra.mxu1 %v3657_v27  ;;  %1932 = vmatprep.subr.bf16.mxu0 %v3658_v28  ;;  %v3727_v19 = vld [vmem:[#allocation5 + $0xf8] ss:$24 sps:$4 sm:$0xff]   ;;  %v3735_v21 = vld [vmem:[#allocation5 + $0xcc] ss:$24 sps:$4 sm:$0xff]   ;;  %v3733_v23 = vld [vmem:[#allocation5 + $0xc8] ss:$24 sps:$4 sm:$0xff]  }
  0x8c   :  { %1973 = vmatprep.subr.bf16.mxu1 %v3660_v29  ;;  %v3730_v22 = vld [vmem:[#allocation5 + $0x6c0] ss:$24 sps:$4 sm:$0xff]   ;;  %v3738_v24 = vld [vmem:[#allocation5 + $0x694] ss:$24 sps:$4 sm:$0xff]   ;;  %v3736_v26 = vld [vmem:[#allocation5 + $0x690] ss:$24 sps:$4 sm:$0xff]  }
  0x8d   :  { %v3741_v25 = vld [vmem:[#allocation5 + $0x9c] ss:$24 sps:$4 sm:$0xff]   ;;  %v3739_v27 = vld [vmem:[#allocation5 + $0x98] ss:$24 sps:$4 sm:$0xff]   ;;  %v3747_v29 = vld [vmem:[#allocation5 + $0x6c] ss:$24 sps:$4 sm:$0xff]  }
  0x8e   :  { %1933 = vmatpush1.bf16.msra.mxu0 %v3662_v30  ;;  %v3744_v28 = vld [vmem:[#allocation5 + $0x664] ss:$24 sps:$4 sm:$0xff]   ;;  %v3742_v30 = vld [vmem:[#allocation5 + $0x660] ss:$24 sps:$4 sm:$0xff]   ;;  %v3798_v4 = vld [vmem:[#allocation5 + $0x7b4] ss:$24 sps:$4 sm:$0xff]  }
  0x8f   :  { %1974 = vmatpush1.bf16.msra.mxu1 %v3663_v31  ;;  %1934 = vmatprep.subr.bf16.mxu0 %v3664_v32  ;;  %v3745_v31 = vld [vmem:[#allocation5 + $0x68] ss:$24 sps:$4 sm:$0xff]   ;;  %v3750_v32 = vld [vmem:[#allocation5 + $0x634] ss:$24 sps:$4 sm:$0xff]   ;;  %v3768_v46 = vld [vmem:[#allocation5 + $0x8a4] ss:$24 sps:$4 sm:$0xff]  }
  0x90   :  { %1975 = vmatprep.subr.bf16.mxu1 %v3666_v33  ;;  %v3753_v33 = vld [vmem:[#allocation5 + $0x3c] ss:$24 sps:$4 sm:$0xff]   ;;  %v3769_v50 = vld [vmem:[#allocation5 + $0x2a8] ss:$24 sps:$4 sm:$0xff]   ;;  %s4364_s11 = scalar_lea.vmem %s3158_s8, 128 }
  0x91   :  { %v3801_v5 = vld [vmem:[#allocation5 + $0x1bc] ss:$24 sps:$4 sm:$0xff]   ;;  %p4365_p3 = scmp.ne.s32.totalorder %s3158_s8, %s4364_s11  ;;  %p4370_p5 = scmp.lt.s32.totalorder %s4364_s11, %s4364_s11 }
  0x92   :  { %1935 = vmatpush2.bf16.msra.mxu0 %v3668_v34  ;;  %v151_v34 = vld [vmem:[#allocation2 + $0x28] sm:$0xff] }
  0x93   :  { %1976 = vmatpush2.bf16.msra.mxu1 %v3669_v35  ;;  %1936 = vmatprep.subr.bf16.mxu0 %v3670_v36  ;;  %v4502_v35 = vpack.c.bf16 %v151_v34, %v151_v34  ;;  %v3748_v36 = vld [vmem:[#allocation5 + $0x630] ss:$24 sps:$4 sm:$0xff]   ;;  %p4371_p6 = por %p4370_p5, %p4369_p4 }
  0x94   :  { %1977 = vmatprep.subr.bf16.mxu1 %v3672_v37  ;;  %v3751_v37 = vld [vmem:[#allocation5 + $0x38] ss:$24 sps:$4 sm:$0xff]  }
  0x95   :  { %v3832_v34 = vld [vmem:[#allocation5 + $0x398] ss:$24 sps:$4 sm:$0xff]   ;;  %p4372_p7 = pnand %p4371_p6, %p4365_p3 }
  0x96   :  { %1937 = vmatpush2.bf16.msra.mxu0 %v3674_v38  ;;  %v3756_v38 = vld [vmem:[#allocation5 + $0x604] ss:$24 sps:$4 sm:$0xff]  }
  0x97   :  { %1978 = vmatpush2.bf16.msra.mxu1 %v3675_v39  ;;  %1938 = vmatprep.subr.bf16.mxu0 %v3676_v40  ;;  %v3759_v39 = vld [vmem:[#allocation5 + $0xc] ss:$24 sps:$4 sm:$0xff]   ;;  %v3754_v40 = vld [vmem:[#allocation5 + $0x600] ss:$24 sps:$4 sm:$0xff]  }
  0x98   :  { %1979 = vmatprep.subr.bf16.mxu1 %v3678_v41  ;;  %v3757_v41 = vld [vmem:[#allocation5 + $0x8] ss:$24 sps:$4 sm:$0xff]  }
  0x9a   :  { %1939 = vmatpush2.bf16.msra.mxu0 %v3680_v42  ;;  %v3762_v42 = vld [vmem:[#allocation5 + $0x8d4] ss:$24 sps:$4 sm:$0xff]  }
  0x9b   :  { %1980 = vmatpush2.bf16.msra.mxu1 %v3681_v43  ;;  %1940 = vmatprep.subr.bf16.mxu0 %v3682_v44  ;;  %v3765_v43 = vld [vmem:[#allocation5 + $0x2dc] ss:$24 sps:$4 sm:$0xff]   ;;  %v3760_v44 = vld [vmem:[#allocation5 + $0x8d0] ss:$24 sps:$4 sm:$0xff]  }
  0x9c   :  { %1981 = vmatprep.subr.bf16.mxu1 %v3684_v45  ;;  %v3763_v45 = vld [vmem:[#allocation5 + $0x2d8] ss:$24 sps:$4 sm:$0xff]  }
  0x9e   :  { %1941 = vmatpush2.bf16.msra.mxu0 %v3686_v47  ;;  %v3771_v47 = vld [vmem:[#allocation5 + $0x2ac] ss:$24 sps:$4 sm:$0xff]  }
  0x9f   :  { %1982 = vmatpush2.bf16.msra.mxu1 %v3687_v48  ;;  %1942 = vmatprep.subr.bf16.mxu0 %v3688_v51  ;;  %v3766_v48 = vld [vmem:[#allocation5 + $0x8a0] ss:$24 sps:$4 sm:$0xff]   ;;  %v3774_v51 = vld [vmem:[#allocation5 + $0x874] ss:$24 sps:$4 sm:$0xff]  }
  0xa0   :  { %1983 = vmatprep.subr.bf16.mxu1 %v3690_v53  ;;  %v3777_v53 = vld [vmem:[#allocation5 + $0x27c] ss:$24 sps:$4 sm:$0xff]  }
  0xa2   :  { %1943 = vmatpush2.bf16.msra.mxu0 %v3692_v54  ;;  %v3772_v54 = vld [vmem:[#allocation5 + $0x870] ss:$24 sps:$4 sm:$0xff]  }
  0xa3   :  { %1984 = vmatpush2.bf16.msra.mxu1 %v3693_v55  ;;  %1944 = vmatprep.subr.bf16.mxu0 %v3694_v56  ;;  %v3775_v55 = vld [vmem:[#allocation5 + $0x278] ss:$24 sps:$4 sm:$0xff]   ;;  %v3780_v56 = vld [vmem:[#allocation5 + $0x844] ss:$24 sps:$4 sm:$0xff]  }
  0xa4   :  { %1985 = vmatprep.subr.bf16.mxu1 %v3696_v57  ;;  %v3783_v57 = vld [vmem:[#allocation5 + $0x24c] ss:$24 sps:$4 sm:$0xff]  }
  0xa6   :  { %1945 = vmatpush2.bf16.msra.mxu0 %v3698_v58  ;;  %v3778_v58 = vld [vmem:[#allocation5 + $0x840] ss:$24 sps:$4 sm:$0xff]  }
  0xa7   :  { %1986 = vmatpush2.bf16.msra.mxu1 %v3699_v59  ;;  %1946 = vmatprep.subr.bf16.mxu0 %v3700_v60  ;;  %v3781_v59 = vld [vmem:[#allocation5 + $0x248] ss:$24 sps:$4 sm:$0xff]   ;;  %v3786_v60 = vld [vmem:[#allocation5 + $0x814] ss:$24 sps:$4 sm:$0xff]  }
  0xa8   :  { %1987 = vmatprep.subr.bf16.mxu1 %v3702_v61  ;;  %v3789_v61 = vld [vmem:[#allocation5 + $0x21c] ss:$24 sps:$4 sm:$0xff]  }
  0xaa   :  { %1947 = vmatpush2.bf16.msra.mxu0 %v3704_v62  ;;  %v3784_v62 = vld [vmem:[#allocation5 + $0x810] ss:$24 sps:$4 sm:$0xff]  }
  0xab   :  { %1988 = vmatpush2.bf16.msra.mxu1 %v3705_v63  ;;  %1948 = vmatprep.subr.bf16.mxu0 %v3706_v0  ;;  %v3787_v63 = vld [vmem:[#allocation5 + $0x218] ss:$24 sps:$4 sm:$0xff]   ;;  %v3792_v0 = vld [vmem:[#allocation5 + $0x7e4] ss:$24 sps:$4 sm:$0xff]  }
  0xac   :  { %1989 = vmatprep.subr.bf16.mxu1 %v3708_v1  ;;  %v3795_v1 = vld [vmem:[#allocation5 + $0x1ec] ss:$24 sps:$4 sm:$0xff]  }
  0xae   :  { %1949 = vmatpush2.bf16.msra.mxu0 %v3710_v2  ;;  %v3790_v2 = vld [vmem:[#allocation5 + $0x7e0] ss:$24 sps:$4 sm:$0xff]  }
  0xaf   :  { %1990 = vmatpush2.bf16.msra.mxu1 %v3711_v3  ;;  %2000 = vmatprep.subr.bf16.mxu0 %v3714_v6  ;;  %v3793_v3 = vld [vmem:[#allocation5 + $0x1e8] ss:$24 sps:$4 sm:$0xff]  }
  0xb0   :  { %2041 = vmatprep.subr.bf16.mxu1 %v3717_v7  ;;  %v3796_v6 = vld [vmem:[#allocation5 + $0x7b0] ss:$24 sps:$4 sm:$0xff]  }
  0xb1   :  { %1951 = vmatmul.mubr.bf16.vlgmr.msra.gmra.mxu0 %v4495_v8  ;;  %v3799_v7 = vld [vmem:[#allocation5 + $0x1b8] ss:$24 sps:$4 sm:$0xff]  }
  0xb2   :  { %1992 = vmatmul.mubr.bf16.vlgmr.msra.gmra.mxu1 %v4497_v9  ;;  %2001 = vmatpush1.bf16.msra.mxu0 %v3712_v10  ;;  %v3804_v10 = vld [vmem:[#allocation5 + $0x784] ss:$24 sps:$4 sm:$0xff]  }
  0xb3   :  { %2042 = vmatpush1.bf16.msra.mxu1 %v3715_v11  ;;  %2002 = vmatprep.subr.bf16.mxu0 %v3720_v12  ;;  %v3807_v11 = vld [vmem:[#allocation5 + $0x18c] ss:$24 sps:$4 sm:$0xff]   ;;  %v3802_v12 = vld [vmem:[#allocation5 + $0x780] ss:$24 sps:$4 sm:$0xff]  }
  0xb4   :  { %2043 = vmatprep.subr.bf16.mxu1 %v3723_v13  ;;  %2073 = vmatprep.mubr.bf16.mxu1 %v4489_v49  ;;  %v3805_v13 = vld [vmem:[#allocation5 + $0x188] ss:$24 sps:$4 sm:$0xff]  }
  0xb5   :  { %2032 = vmatprep.mubr.bf16.mxu0 %v4502_v35 }
  0xb6   :  { %2003 = vmatpush1.bf16.msra.mxu0 %v3718_v14  ;;  %v150_v14 = vld [vmem:[#allocation2 + $0x20] sm:$0xff] }
  0xb7   :  { %2044 = vmatpush1.bf16.msra.mxu1 %v3721_v15  ;;  %2004 = vmatprep.subr.bf16.mxu0 %v3726_v16  ;;  %v3810_v15 = vld [vmem:[#allocation5 + $0x45c] ss:$24 sps:$4 sm:$0xff]  }
  0xb8   :  { %2045 = vmatprep.subr.bf16.mxu1 %v3729_v17  ;;  %v3813_v16 = vld [vmem:[#allocation5 + $0x75c] ss:$24 sps:$4 sm:$0xff]   ;;  %v4505_v17 = vpack.c.bf16 %v150_v14, %v150_v14 }
  0xb9   :  { %v3897_v14 = vld [vmem:[#allocation5 + $0x7bc] ss:$24 sps:$4 sm:$0xff]  }
  0xba   :  { %2005 = vmatpush1.bf16.msra.mxu0 %v3724_v18  ;;  %v3808_v18 = vld [vmem:[#allocation5 + $0x458] ss:$24 sps:$4 sm:$0xff]  }
  0xbb   :  { %2046 = vmatpush1.bf16.msra.mxu1 %v3727_v19  ;;  %2006 = vmatprep.subr.bf16.mxu0 %v3732_v20  ;;  %v3811_v19 = vld [vmem:[#allocation5 + $0x758] ss:$24 sps:$4 sm:$0xff]   ;;  %v3816_v20 = vld [vmem:[#allocation5 + $0x42c] ss:$24 sps:$4 sm:$0xff]  }
  0xbc   :  { %2047 = vmatprep.subr.bf16.mxu1 %v3735_v21  ;;  %v3819_v21 = vld [vmem:[#allocation5 + $0x72c] ss:$24 sps:$4 sm:$0xff]  }
  0xbe   :  { %2007 = vmatpush1.bf16.msra.mxu0 %v3730_v22  ;;  %v3814_v22 = vld [vmem:[#allocation5 + $0x428] ss:$24 sps:$4 sm:$0xff]  }
  0xbf   :  { %2048 = vmatpush1.bf16.msra.mxu1 %v3733_v23  ;;  %2008 = vmatprep.subr.bf16.mxu0 %v3738_v24  ;;  %v3817_v23 = vld [vmem:[#allocation5 + $0x728] ss:$24 sps:$4 sm:$0xff]   ;;  %v3822_v24 = vld [vmem:[#allocation5 + $0x3fc] ss:$24 sps:$4 sm:$0xff]  }
  0xc0   :  { %2049 = vmatprep.subr.bf16.mxu1 %v3741_v25  ;;  %v3825_v25 = vld [vmem:[#allocation5 + $0x6fc] ss:$24 sps:$4 sm:$0xff]  }
  0xc2   :  { %2009 = vmatpush1.bf16.msra.mxu0 %v3736_v26  ;;  %v3820_v26 = vld [vmem:[#allocation5 + $0x3f8] ss:$24 sps:$4 sm:$0xff]  }
  0xc3   :  { %2050 = vmatpush1.bf16.msra.mxu1 %v3739_v27  ;;  %2010 = vmatprep.subr.bf16.mxu0 %v3744_v28  ;;  %v3823_v27 = vld [vmem:[#allocation5 + $0x6f8] ss:$24 sps:$4 sm:$0xff]   ;;  %v3828_v28 = vld [vmem:[#allocation5 + $0x3cc] ss:$24 sps:$4 sm:$0xff]  }
  0xc4   :  { %2051 = vmatprep.subr.bf16.mxu1 %v3747_v29  ;;  %v3831_v29 = vld [vmem:[#allocation5 + $0x6cc] ss:$24 sps:$4 sm:$0xff]  }
  0xc6   :  { %2011 = vmatpush1.bf16.msra.mxu0 %v3742_v30  ;;  %v3826_v30 = vld [vmem:[#allocation5 + $0x3c8] ss:$24 sps:$4 sm:$0xff]  }
  0xc7   :  { %2052 = vmatpush1.bf16.msra.mxu1 %v3745_v31  ;;  %2012 = vmatprep.subr.bf16.mxu0 %v3750_v32  ;;  %v3829_v31 = vld [vmem:[#allocation5 + $0x6c8] ss:$24 sps:$4 sm:$0xff]   ;;  %v3834_v32 = vld [vmem:[#allocation5 + $0x39c] ss:$24 sps:$4 sm:$0xff]  }
  0xc8   :  { %2053 = vmatprep.subr.bf16.mxu1 %v3753_v33  ;;  %v3837_v33 = vld [vmem:[#allocation5 + $0x69c] ss:$24 sps:$4 sm:$0xff]  }
  0xca   :  { %2013 = vmatpush1.bf16.msra.mxu0 %v3748_v36  ;;  %v3835_v36 = vld [vmem:[#allocation5 + $0x698] ss:$24 sps:$4 sm:$0xff]  }
  0xcb   :  { %2054 = vmatpush1.bf16.msra.mxu1 %v3751_v37  ;;  %2014 = vmatprep.subr.bf16.mxu0 %v3756_v38  ;;  %v3840_v37 = vld [vmem:[#allocation5 + $0x36c] ss:$24 sps:$4 sm:$0xff]  }
  0xcc   :  { %2055 = vmatprep.subr.bf16.mxu1 %v3759_v39  ;;  %v3843_v38 = vld [vmem:[#allocation5 + $0x66c] ss:$24 sps:$4 sm:$0xff]   ;;  %v3838_v39 = vld [vmem:[#allocation5 + $0x368] ss:$24 sps:$4 sm:$0xff]  }
  0xce   :  { %2015 = vmatpush1.bf16.msra.mxu0 %v3754_v40  ;;  %v3841_v40 = vld [vmem:[#allocation5 + $0x668] ss:$24 sps:$4 sm:$0xff]  }
  0xcf   :  { %2056 = vmatpush1.bf16.msra.mxu1 %v3757_v41  ;;  %2016 = vmatprep.subr.bf16.mxu0 %v3762_v42  ;;  %v3846_v41 = vld [vmem:[#allocation5 + $0x33c] ss:$24 sps:$4 sm:$0xff]  }
  0xd0   :  { %2057 = vmatprep.subr.bf16.mxu1 %v3765_v43  ;;  %v3849_v42 = vld [vmem:[#allocation5 + $0x63c] ss:$24 sps:$4 sm:$0xff]   ;;  %v3844_v43 = vld [vmem:[#allocation5 + $0x338] ss:$24 sps:$4 sm:$0xff]  }
  0xd2   :  { %2017 = vmatpush2.bf16.msra.mxu0 %v3760_v44  ;;  %v3847_v44 = vld [vmem:[#allocation5 + $0x638] ss:$24 sps:$4 sm:$0xff]  }
  0xd3   :  { %2058 = vmatpush2.bf16.msra.mxu1 %v3763_v45  ;;  %2018 = vmatprep.subr.bf16.mxu0 %v3768_v46  ;;  %v3852_v45 = vld [vmem:[#allocation5 + $0x30c] ss:$24 sps:$4 sm:$0xff]  }
  0xd4   :  { %2059 = vmatprep.subr.bf16.mxu1 %v3771_v47  ;;  %v3855_v46 = vld [vmem:[#allocation5 + $0x60c] ss:$24 sps:$4 sm:$0xff]   ;;  %v3850_v47 = vld [vmem:[#allocation5 + $0x308] ss:$24 sps:$4 sm:$0xff]  }
  0xd6   :  { %2019 = vmatpush2.bf16.msra.mxu0 %v3766_v48  ;;  %v3853_v48 = vld [vmem:[#allocation5 + $0x608] ss:$24 sps:$4 sm:$0xff]  }
  0xd7   :  { %2060 = vmatpush2.bf16.msra.mxu1 %v3769_v50  ;;  %2020 = vmatprep.subr.bf16.mxu0 %v3774_v51  ;;  %v3858_v50 = vld [vmem:[#allocation5 + $0x5dc] ss:$24 sps:$4 sm:$0xff]  }
  0xd8   :  { %2061 = vmatprep.subr.bf16.mxu1 %v3777_v53  ;;  %v3861_v51 = vld [vmem:[#allocation5 + $0x8dc] ss:$24 sps:$4 sm:$0xff]   ;;  %v3856_v53 = vld [vmem:[#allocation5 + $0x5d8] ss:$24 sps:$4 sm:$0xff]  }
  0xda   :  { %2021 = vmatpush2.bf16.msra.mxu0 %v3772_v54  ;;  %v3859_v54 = vld [vmem:[#allocation5 + $0x8d8] ss:$24 sps:$4 sm:$0xff]  }
  0xdb   :  { %2062 = vmatpush2.bf16.msra.mxu1 %v3775_v55  ;;  %2022 = vmatprep.subr.bf16.mxu0 %v3780_v56  ;;  %v3864_v55 = vld [vmem:[#allocation5 + $0x5ac] ss:$24 sps:$4 sm:$0xff]  }
  0xdc   :  { %2063 = vmatprep.subr.bf16.mxu1 %v3783_v57  ;;  %v3867_v56 = vld [vmem:[#allocation5 + $0x8ac] ss:$24 sps:$4 sm:$0xff]   ;;  %v3862_v57 = vld [vmem:[#allocation5 + $0x5a8] ss:$24 sps:$4 sm:$0xff]  }
  0xde   :  { %2023 = vmatpush2.bf16.msra.mxu0 %v3778_v58  ;;  %v3865_v58 = vld [vmem:[#allocation5 + $0x8a8] ss:$24 sps:$4 sm:$0xff]  }
  0xdf   :  { %2064 = vmatpush2.bf16.msra.mxu1 %v3781_v59  ;;  %2024 = vmatprep.subr.bf16.mxu0 %v3786_v60  ;;  %v3870_v59 = vld [vmem:[#allocation5 + $0x57c] ss:$24 sps:$4 sm:$0xff]  }
  0xe0   :  { %2065 = vmatprep.subr.bf16.mxu1 %v3789_v61  ;;  %v3873_v60 = vld [vmem:[#allocation5 + $0x87c] ss:$24 sps:$4 sm:$0xff]   ;;  %v3868_v61 = vld [vmem:[#allocation5 + $0x578] ss:$24 sps:$4 sm:$0xff]  }
  0xe2   :  { %2025 = vmatpush2.bf16.msra.mxu0 %v3784_v62  ;;  %v3871_v62 = vld [vmem:[#allocation5 + $0x878] ss:$24 sps:$4 sm:$0xff]  }
  0xe3   :  { %2066 = vmatpush2.bf16.msra.mxu1 %v3787_v63  ;;  %2026 = vmatprep.subr.bf16.mxu0 %v3792_v0  ;;  %v3876_v63 = vld [vmem:[#allocation5 + $0x54c] ss:$24 sps:$4 sm:$0xff]  }
  0xe4   :  { %2067 = vmatprep.subr.bf16.mxu1 %v3795_v1  ;;  %v3879_v0 = vld [vmem:[#allocation5 + $0x84c] ss:$24 sps:$4 sm:$0xff]   ;;  %v3874_v1 = vld [vmem:[#allocation5 + $0x548] ss:$24 sps:$4 sm:$0xff]  }
  0xe6   :  { %2027 = vmatpush2.bf16.msra.mxu0 %v3790_v2  ;;  %v3877_v2 = vld [vmem:[#allocation5 + $0x848] ss:$24 sps:$4 sm:$0xff]  }
  0xe7   :  { %2068 = vmatpush2.bf16.msra.mxu1 %v3793_v3  ;;  %2028 = vmatprep.subr.bf16.mxu0 %v3798_v4  ;;  %v3882_v3 = vld [vmem:[#allocation5 + $0x51c] ss:$24 sps:$4 sm:$0xff]  }
  0xe8   :  { %2069 = vmatprep.subr.bf16.mxu1 %v3801_v5  ;;  %v3885_v4 = vld [vmem:[#allocation5 + $0x81c] ss:$24 sps:$4 sm:$0xff]   ;;  %v3880_v5 = vld [vmem:[#allocation5 + $0x518] ss:$24 sps:$4 sm:$0xff]  }
  0xea   :  { %2029 = vmatpush2.bf16.msra.mxu0 %v3796_v6  ;;  %v3883_v6 = vld [vmem:[#allocation5 + $0x818] ss:$24 sps:$4 sm:$0xff]  }
  0xeb   :  { %2070 = vmatpush2.bf16.msra.mxu1 %v3799_v7  ;;  %2030 = vmatprep.subr.bf16.mxu0 %v3804_v10  ;;  %v3888_v7 = vld [vmem:[#allocation5 + $0x4ec] ss:$24 sps:$4 sm:$0xff]  }
  0xec   :  { %2071 = vmatprep.subr.bf16.mxu1 %v3807_v11  ;;  %v3891_v10 = vld [vmem:[#allocation5 + $0x7ec] ss:$24 sps:$4 sm:$0xff]   ;;  %v3886_v11 = vld [vmem:[#allocation5 + $0x4e8] ss:$24 sps:$4 sm:$0xff]  }
  0xee   :  { %2031 = vmatpush2.bf16.msra.mxu0 %v3802_v12  ;;  %v3889_v12 = vld [vmem:[#allocation5 + $0x7e8] ss:$24 sps:$4 sm:$0xff]  }
  0xef   :  { %2072 = vmatpush2.bf16.msra.mxu1 %v3805_v13  ;;  %2082 = vmatprep.subr.bf16.mxu0 %v3810_v15  ;;  %v3894_v13 = vld [vmem:[#allocation5 + $0x4bc] ss:$24 sps:$4 sm:$0xff]   ;;  %v3892_v15 = vld [vmem:[#allocation5 + $0x4b8] ss:$24 sps:$4 sm:$0xff]  }
  0xf0   :  { %2123 = vmatprep.subr.bf16.mxu1 %v3813_v16  ;;  %v3895_v16 = vld [vmem:[#allocation5 + $0x7b8] ss:$24 sps:$4 sm:$0xff]  }
  0xf1   :  { %2033 = vmatmul.mubr.bf16.vlgmr.msra.gmra.mxu0 %v4505_v17 }
  0xf2   :  { %2074 = vmatmul.mubr.bf16.vlgmr.msra.gmra.mxu1 %v4495_v8  ;;  %2083 = vmatpush1.bf16.msra.mxu0 %v3808_v18  ;;  %v3900_v18 = vld [vmem:[#allocation5 + $0x48c] ss:$24 sps:$4 sm:$0xff]  }
  0xf3   :  { %2124 = vmatpush1.bf16.msra.mxu1 %v3811_v19  ;;  %2084 = vmatprep.subr.bf16.mxu0 %v3816_v20  ;;  %v3903_v19 = vld [vmem:[#allocation5 + $0x78c] ss:$24 sps:$4 sm:$0xff]   ;;  %v3898_v20 = vld [vmem:[#allocation5 + $0x488] ss:$24 sps:$4 sm:$0xff]  }
  0xf4   :  { %2125 = vmatprep.subr.bf16.mxu1 %v3819_v21  ;;  %2114 = vmatprep.mubr.bf16.mxu0 %v4491_v52  ;;  %v3901_v21 = vld [vmem:[#allocation5 + $0x788] ss:$24 sps:$4 sm:$0xff]  }
  0xf5   :  { %2155 = vmatprep.mubr.bf16.mxu1 %v4502_v35 }
  0xf6   :  { %2085 = vmatpush1.bf16.msra.mxu0 %v3814_v22  ;;  %v3906_v22 = vld [vmem:[#allocation5 + $0x164] ss:$24 sps:$4 sm:$0xff]  }
  0xf7   :  { %2126 = vmatpush1.bf16.msra.mxu1 %v3817_v23  ;;  %2086 = vmatprep.subr.bf16.mxu0 %v3822_v24  ;;  %v3915_v23 = vld [vmem:[#allocation5 + $0x464] ss:$24 sps:$4 sm:$0xff]   ;;  %v3904_v24 = vld [vmem:[#allocation5 + $0x160] ss:$24 sps:$4 sm:$0xff]  }
  0xf8   :  { %2127 = vmatprep.subr.bf16.mxu1 %v3825_v25  ;;  %v3909_v25 = vld [vmem:[#allocation5 + $0x134] ss:$24 sps:$4 sm:$0xff]  }
  0xfa   :  { %2087 = vmatpush1.bf16.msra.mxu0 %v3820_v26  ;;  %v3913_v26 = vld [vmem:[#allocation5 + $0x460] ss:$24 sps:$4 sm:$0xff]  }
  0xfb   :  { %2128 = vmatpush1.bf16.msra.mxu1 %v3823_v27  ;;  %2088 = vmatprep.subr.bf16.mxu0 %v3828_v28  ;;  %v3921_v27 = vld [vmem:[#allocation5 + $0x434] ss:$24 sps:$4 sm:$0xff]   ;;  %v3907_v28 = vld [vmem:[#allocation5 + $0x130] ss:$24 sps:$4 sm:$0xff]  }
  0xfc   :  { %2129 = vmatprep.subr.bf16.mxu1 %v3831_v29  ;;  %v3912_v29 = vld [vmem:[#allocation5 + $0x104] ss:$24 sps:$4 sm:$0xff]  }
  0xfe   :  { %2089 = vmatpush1.bf16.msra.mxu0 %v3826_v30  ;;  %v3919_v30 = vld [vmem:[#allocation5 + $0x430] ss:$24 sps:$4 sm:$0xff]  }
  0xff   :  { %2130 = vmatpush1.bf16.msra.mxu1 %v3829_v31  ;;  %2090 = vmatprep.subr.bf16.mxu0 %v3834_v32  ;;  %v3927_v31 = vld [vmem:[#allocation5 + $0x404] ss:$24 sps:$4 sm:$0xff]   ;;  %v3910_v32 = vld [vmem:[#allocation5 + $0x100] ss:$24 sps:$4 sm:$0xff]  }
 0x100   :  { %2131 = vmatprep.subr.bf16.mxu1 %v3837_v33  ;;  %v3918_v33 = vld [vmem:[#allocation5 + $0xd4] ss:$24 sps:$4 sm:$0xff]  }
 0x102   :  { %2091 = vmatpush1.bf16.msra.mxu0 %v3832_v34  ;;  %v3925_v34 = vld [vmem:[#allocation5 + $0x400] ss:$24 sps:$4 sm:$0xff]  }
 0x103   :  { %2132 = vmatpush1.bf16.msra.mxu1 %v3835_v36  ;;  %2092 = vmatprep.subr.bf16.mxu0 %v3840_v37  ;;  %v3933_v36 = vld [vmem:[#allocation5 + $0x3d4] ss:$24 sps:$4 sm:$0xff]   ;;  %v3916_v37 = vld [vmem:[#allocation5 + $0xd0] ss:$24 sps:$4 sm:$0xff]  }
 0x104   :  { %2133 = vmatprep.subr.bf16.mxu1 %v3843_v38  ;;  %v3924_v38 = vld [vmem:[#allocation5 + $0xa4] ss:$24 sps:$4 sm:$0xff]  }
 0x106   :  { %2093 = vmatpush1.bf16.msra.mxu0 %v3838_v39  ;;  %v3931_v39 = vld [vmem:[#allocation5 + $0x3d0] ss:$24 sps:$4 sm:$0xff]  }
 0x107   :  { %2134 = vmatpush1.bf16.msra.mxu1 %v3841_v40  ;;  %2094 = vmatprep.subr.bf16.mxu0 %v3846_v41  ;;  %v3939_v40 = vld [vmem:[#allocation5 + $0x3a4] ss:$24 sps:$4 sm:$0xff]   ;;  %v3922_v41 = vld [vmem:[#allocation5 + $0xa0] ss:$24 sps:$4 sm:$0xff]  }
 0x108   :  { %2135 = vmatprep.subr.bf16.mxu1 %v3849_v42  ;;  %v3945_v42 = vld [vmem:[#allocation5 + $0x374] ss:$24 sps:$4 sm:$0xff]  }
 0x10a   :  { %2095 = vmatpush1.bf16.msra.mxu0 %v3844_v43  ;;  %v3928_v43 = vld [vmem:[#allocation5 + $0x70] ss:$24 sps:$4 sm:$0xff]  }
 0x10b   :  { %2136 = vmatpush1.bf16.msra.mxu1 %v3847_v44  ;;  %2096 = vmatprep.subr.bf16.mxu0 %v3852_v45  ;;  %v3936_v44 = vld [vmem:[#allocation5 + $0x44] ss:$24 sps:$4 sm:$0xff]   ;;  %v3943_v45 = vld [vmem:[#allocation5 + $0x370] ss:$24 sps:$4 sm:$0xff]  }
 0x10c   :  { %2137 = vmatprep.subr.bf16.mxu1 %v3855_v46  ;;  %v3951_v46 = vld [vmem:[#allocation5 + $0x344] ss:$24 sps:$4 sm:$0xff]  }
 0x10e   :  { %2097 = vmatpush1.bf16.msra.mxu0 %v3850_v47  ;;  %v3934_v47 = vld [vmem:[#allocation5 + $0x40] ss:$24 sps:$4 sm:$0xff]  }
 0x10f   :  { %2138 = vmatpush1.bf16.msra.mxu1 %v3853_v48  ;;  %2098 = vmatprep.subr.bf16.mxu0 %v3858_v50  ;;  %v3942_v48 = vld [vmem:[#allocation5 + $0x14] ss:$24 sps:$4 sm:$0xff]   ;;  %v3949_v50 = vld [vmem:[#allocation5 + $0x340] ss:$24 sps:$4 sm:$0xff]  }
 0x110   :  { %2139 = vmatprep.subr.bf16.mxu1 %v3861_v51  ;;  %v3957_v51 = vld [vmem:[#allocation5 + $0x314] ss:$24 sps:$4 sm:$0xff]  }
 0x112   :  { %2099 = vmatpush2.bf16.msra.mxu0 %v3856_v53  ;;  %v3940_v53 = vld [vmem:[#allocation5 + $0x10] ss:$24 sps:$4 sm:$0xff]  }
 0x113   :  { %2140 = vmatpush2.bf16.msra.mxu1 %v3859_v54  ;;  %2100 = vmatprep.subr.bf16.mxu0 %v3864_v55  ;;  %v3948_v54 = vld [vmem:[#allocation5 + $0x2e4] ss:$24 sps:$4 sm:$0xff]   ;;  %v3955_v55 = vld [vmem:[#allocation5 + $0x310] ss:$24 sps:$4 sm:$0xff]  }
 0x114   :  { %2141 = vmatprep.subr.bf16.mxu1 %v3867_v56  ;;  %v3963_v56 = vld [vmem:[#allocation5 + $0x5e4] ss:$24 sps:$4 sm:$0xff]  }
 0x116   :  { %2101 = vmatpush2.bf16.msra.mxu0 %v3862_v57  ;;  %v3946_v57 = vld [vmem:[#allocation5 + $0x2e0] ss:$24 sps:$4 sm:$0xff]  }
 0x117   :  { %2142 = vmatpush2.bf16.msra.mxu1 %v3865_v58  ;;  %2102 = vmatprep.subr.bf16.mxu0 %v3870_v59  ;;  %v3954_v58 = vld [vmem:[#allocation5 + $0x2b4] ss:$24 sps:$4 sm:$0xff]   ;;  %v3961_v59 = vld [vmem:[#allocation5 + $0x5e0] ss:$24 sps:$4 sm:$0xff]  }
 0x118   :  { %2143 = vmatprep.subr.bf16.mxu1 %v3873_v60  ;;  %v3969_v60 = vld [vmem:[#allocation5 + $0x5b4] ss:$24 sps:$4 sm:$0xff]  }
 0x11a   :  { %2103 = vmatpush2.bf16.msra.mxu0 %v3868_v61  ;;  %v3952_v61 = vld [vmem:[#allocation5 + $0x2b0] ss:$24 sps:$4 sm:$0xff]  }
 0x11b   :  { %2144 = vmatpush2.bf16.msra.mxu1 %v3871_v62  ;;  %2104 = vmatprep.subr.bf16.mxu0 %v3876_v63  ;;  %v3960_v62 = vld [vmem:[#allocation5 + $0x284] ss:$24 sps:$4 sm:$0xff]   ;;  %v3967_v63 = vld [vmem:[#allocation5 + $0x5b0] ss:$24 sps:$4 sm:$0xff]  }
 0x11c   :  { %2145 = vmatprep.subr.bf16.mxu1 %v3879_v0  ;;  %v3975_v0 = vld [vmem:[#allocation5 + $0x584] ss:$24 sps:$4 sm:$0xff]  }
 0x11e   :  { %2105 = vmatpush2.bf16.msra.mxu0 %v3874_v1  ;;  %v3958_v1 = vld [vmem:[#allocation5 + $0x280] ss:$24 sps:$4 sm:$0xff]  }
 0x11f   :  { %2146 = vmatpush2.bf16.msra.mxu1 %v3877_v2  ;;  %2106 = vmatprep.subr.bf16.mxu0 %v3882_v3  ;;  %v3966_v2 = vld [vmem:[#allocation5 + $0x254] ss:$24 sps:$4 sm:$0xff]   ;;  %v3973_v3 = vld [vmem:[#allocation5 + $0x580] ss:$24 sps:$4 sm:$0xff]  }
 0x120   :  { %2147 = vmatprep.subr.bf16.mxu1 %v3885_v4  ;;  %v3981_v4 = vld [vmem:[#allocation5 + $0x554] ss:$24 sps:$4 sm:$0xff]  }
 0x122   :  { %2107 = vmatpush2.bf16.msra.mxu0 %v3880_v5  ;;  %v3964_v5 = vld [vmem:[#allocation5 + $0x250] ss:$24 sps:$4 sm:$0xff]  }
 0x123   :  { %2148 = vmatpush2.bf16.msra.mxu1 %v3883_v6  ;;  %2108 = vmatprep.subr.bf16.mxu0 %v3888_v7  ;;  %v3972_v6 = vld [vmem:[#allocation5 + $0x224] ss:$24 sps:$4 sm:$0xff]   ;;  %v3979_v7 = vld [vmem:[#allocation5 + $0x550] ss:$24 sps:$4 sm:$0xff]  }
 0x124   :  { %2149 = vmatprep.subr.bf16.mxu1 %v3891_v10  ;;  %v3987_v10 = vld [vmem:[#allocation5 + $0x524] ss:$24 sps:$4 sm:$0xff]  }
 0x126   :  { %2109 = vmatpush2.bf16.msra.mxu0 %v3886_v11  ;;  %v3970_v11 = vld [vmem:[#allocation5 + $0x220] ss:$24 sps:$4 sm:$0xff]  }
 0x127   :  { %2150 = vmatpush2.bf16.msra.mxu1 %v3889_v12  ;;  %2110 = vmatprep.subr.bf16.mxu0 %v3894_v13  ;;  %v3978_v12 = vld [vmem:[#allocation5 + $0x1f4] ss:$24 sps:$4 sm:$0xff]   ;;  %v3985_v13 = vld [vmem:[#allocation5 + $0x520] ss:$24 sps:$4 sm:$0xff]  }
 0x128   :  { %2151 = vmatprep.subr.bf16.mxu1 %v3897_v14  ;;  %v3993_v14 = vld [vmem:[#allocation5 + $0x4f4] ss:$24 sps:$4 sm:$0xff]  }
 0x12a   :  { %2111 = vmatpush2.bf16.msra.mxu0 %v3892_v15  ;;  %v3976_v15 = vld [vmem:[#allocation5 + $0x1f0] ss:$24 sps:$4 sm:$0xff]  }
 0x12b   :  { %2152 = vmatpush2.bf16.msra.mxu1 %v3895_v16  ;;  %2112 = vmatprep.subr.bf16.mxu0 %v3900_v18  ;;  %v3991_v16 = vld [vmem:[#allocation5 + $0x4f0] ss:$24 sps:$4 sm:$0xff]   ;;  %v3984_v18 = vld [vmem:[#allocation5 + $0x1c4] ss:$24 sps:$4 sm:$0xff]  }
 0x12c   :  { %2153 = vmatprep.subr.bf16.mxu1 %v3903_v19  ;;  %v3999_v19 = vld [vmem:[#allocation5 + $0x4c4] ss:$24 sps:$4 sm:$0xff]  }
 0x12e   :  { %2113 = vmatpush2.bf16.msra.mxu0 %v3898_v20  ;;  %v3982_v20 = vld [vmem:[#allocation5 + $0x1c0] ss:$24 sps:$4 sm:$0xff]  }
 0x12f   :  { %2154 = vmatpush2.bf16.msra.mxu1 %v3901_v21  ;;  %2164 = vmatprep.subr.bf16.mxu0 %v3906_v22  ;;  %v3997_v21 = vld [vmem:[#allocation5 + $0x4c0] ss:$24 sps:$4 sm:$0xff]   ;;  %v3990_v22 = vld [vmem:[#allocation5 + $0x194] ss:$24 sps:$4 sm:$0xff]  }
 0x130   :  { %2205 = vmatprep.subr.bf16.mxu1 %v3915_v23  ;;  %v4005_v23 = vld [vmem:[#allocation5 + $0x494] ss:$24 sps:$4 sm:$0xff]  }
 0x131   :  { %2115 = vmatmul.mubr.bf16.vlgmr.msra.gmra.mxu0 %v4497_v9 }
 0x132   :  { %2156 = vmatmul.mubr.bf16.vlgmr.msra.gmra.mxu1 %v4505_v17  ;;  %2165 = vmatpush1.bf16.msra.mxu0 %v3904_v24  ;;  %v3988_v24 = vld [vmem:[#allocation5 + $0x190] ss:$24 sps:$4 sm:$0xff]  }
 0x133   :  { %2206 = vmatpush1.bf16.msra.mxu1 %v3913_v26  ;;  %2166 = vmatprep.subr.bf16.mxu0 %v3909_v25  ;;  %v4003_v25 = vld [vmem:[#allocation5 + $0x490] ss:$24 sps:$4 sm:$0xff]   ;;  %v3996_v26 = vld [vmem:[#allocation5 + $0x764] ss:$24 sps:$4 sm:$0xff]  }
 0x134   :  { %2207 = vmatprep.subr.bf16.mxu1 %v3921_v27  ;;  %2196 = vmatprep.mubr.bf16.mxu0 %v4489_v49  ;;  %v3930_v49 = vld [vmem:[#allocation5 + $0x74] ss:$24 sps:$4 sm:$0xff]   ;;  %v4011_v27 = vld [vmem:[#allocation8 + $0x74] ss:$8 sps:$4 sm:$0xff]  }
 0x135   :  { %2237 = vmatprep.mubr.bf16.mxu1 %v4491_v52  ;;  %v3937_v52 = vld [vmem:[#allocation5 + $0x3a0] ss:$24 sps:$4 sm:$0xff]  }
 0x136   :  { %2167 = vmatpush1.bf16.msra.mxu0 %v3907_v28  ;;  %v3994_v28 = vld [vmem:[#allocation5 + $0x760] ss:$24 sps:$4 sm:$0xff]  }
 0x137   :  { %2208 = vmatpush1.bf16.msra.mxu1 %v3919_v30  ;;  %2168 = vmatprep.subr.bf16.mxu0 %v3912_v29  ;;  %v4009_v29 = vld [vmem:[#allocation8 + $0x70] ss:$8 sps:$4 sm:$0xff]  }
 0x138   :  { %2209 = vmatprep.subr.bf16.mxu1 %v3927_v31  ;;  %v4002_v30 = vld [vmem:[#allocation5 + $0x734] ss:$24 sps:$4 sm:$0xff]  }
 0x139   :  { %v4017_v31 = vld [vmem:[#allocation8 + $0x64] ss:$8 sps:$4 sm:$0xff]  }
 0x13a   :  { %2169 = vmatpush1.bf16.msra.mxu0 %v3910_v32 }
 0x13b   :  { %2210 = vmatpush1.bf16.msra.mxu1 %v3925_v34  ;;  %2170 = vmatprep.subr.bf16.mxu0 %v3918_v33  ;;  %v4000_v34 = vld [vmem:[#allocation5 + $0x730] ss:$24 sps:$4 sm:$0xff]  }
 0x13c   :  { %2211 = vmatprep.subr.bf16.mxu1 %v3933_v36  ;;  %v4015_v36 = vld [vmem:[#allocation8 + $0x60] ss:$8 sps:$4 sm:$0xff]  }
 0x13e   :  { %2171 = vmatpush1.bf16.msra.mxu0 %v3916_v37 }
 0x13f   :  { %2212 = vmatpush1.bf16.msra.mxu1 %v3931_v39  ;;  %2172 = vmatprep.subr.bf16.mxu0 %v3924_v38  ;;  %v4008_v39 = vld [vmem:[#allocation5 + $0x704] ss:$24 sps:$4 sm:$0xff]  }
 0x140   :  { %2213 = vmatprep.subr.bf16.mxu1 %v3939_v40  ;;  %v4023_v40 = vld [vmem:[#allocation8 + $0x54] ss:$8 sps:$4 sm:$0xff]  }
 0x142   :  { %2173 = vmatpush1.bf16.msra.mxu0 %v3922_v41 }
 0x143   :  { %2214 = vmatpush1.bf16.msra.mxu1 %v3937_v52  ;;  %2174 = vmatprep.subr.bf16.mxu0 %v3930_v49 }
 0x144   :  { %2215 = vmatprep.subr.bf16.mxu1 %v3945_v42 }
 0x146   :  { %2175 = vmatpush1.bf16.msra.mxu0 %v3928_v43  ;;  %v4014_v43 = vld [vmem:[#allocation5 + $0x6d4] ss:$24 sps:$4 sm:$0xff]  }
 0x147   :  { %2216 = vmatpush1.bf16.msra.mxu1 %v3943_v45  ;;  %2176 = vmatprep.subr.bf16.mxu0 %v3936_v44  ;;  %v4029_v44 = vld [vmem:[#allocation8 + $0x44] ss:$8 sps:$4 sm:$0xff]  }
 0x148   :  { %2217 = vmatprep.subr.bf16.mxu1 %v3951_v46  ;;  %v4012_v45 = vld [vmem:[#allocation5 + $0x6d0] ss:$24 sps:$4 sm:$0xff]  }
 0x149   :  { %v4027_v46 = vld [vmem:[#allocation8 + $0x40] ss:$8 sps:$4 sm:$0xff]  }
 0x14a   :  { %2177 = vmatpush1.bf16.msra.mxu0 %v3934_v47  ;;  %v4020_v47 = vld [vmem:[#allocation5 + $0x6a4] ss:$24 sps:$4 sm:$0xff]  }
 0x14b   :  { %2218 = vmatpush1.bf16.msra.mxu1 %v3949_v50  ;;  %2178 = vmatprep.subr.bf16.mxu0 %v3942_v48  ;;  %v4018_v48 = vld [vmem:[#allocation5 + $0x6a0] ss:$24 sps:$4 sm:$0xff]  }
 0x14c   :  { %2219 = vmatprep.subr.bf16.mxu1 %v3957_v51  ;;  %v4033_v50 = vld [vmem:[#allocation8 + $0x30] ss:$8 sps:$4 sm:$0xff]  }
 0x14d   :  { %v4026_v51 = vld [vmem:[#allocation5 + $0x674] ss:$24 sps:$4 sm:$0xff]  }
 0x14e   :  { %2179 = vmatpush1.bf16.msra.mxu0 %v3940_v53  ;;  %v4041_v53 = vld [vmem:[#allocation8 + $0x24] ss:$8 sps:$4 sm:$0xff]  }
 0x14f   :  { %2220 = vmatpush1.bf16.msra.mxu1 %v3955_v55  ;;  %2180 = vmatprep.subr.bf16.mxu0 %v3948_v54  ;;  %v4024_v54 = vld [vmem:[#allocation5 + $0x670] ss:$24 sps:$4 sm:$0xff]  }
 0x150   :  { %2221 = vmatprep.subr.bf16.mxu1 %v3963_v56  ;;  %v4039_v55 = vld [vmem:[#allocation8 + $0x20] ss:$8 sps:$4 sm:$0xff]  }
 0x151   :  { %v4032_v56 = vld [vmem:[#allocation5 + $0x644] ss:$24 sps:$4 sm:$0xff]  }
 0x152   :  { %2181 = vmatpush2.bf16.msra.mxu0 %v3946_v57  ;;  %v4047_v57 = vld [vmem:[#allocation8 + $0x14] ss:$8 sps:$4 sm:$0xff]  }
 0x153   :  { %2222 = vmatpush2.bf16.msra.mxu1 %v3961_v59  ;;  %2182 = vmatprep.subr.bf16.mxu0 %v3954_v58  ;;  %v4030_v58 = vld [vmem:[#allocation5 + $0x640] ss:$24 sps:$4 sm:$0xff]  }
 0x154   :  { %2223 = vmatprep.subr.bf16.mxu1 %v3969_v60  ;;  %v4045_v59 = vld [vmem:[#allocation8 + $0x10] ss:$8 sps:$4 sm:$0xff]  }
 0x155   :  { %v4038_v60 = vld [vmem:[#allocation5 + $0x614] ss:$24 sps:$4 sm:$0xff]  }
 0x156   :  { %2183 = vmatpush2.bf16.msra.mxu0 %v3952_v61  ;;  %v4053_v61 = vld [vmem:[#allocation8 + $0x4] ss:$8 sps:$4 sm:$0xff]  }
 0x157   :  { %2224 = vmatpush2.bf16.msra.mxu1 %v3967_v63  ;;  %2184 = vmatprep.subr.bf16.mxu0 %v3960_v62  ;;  %v4036_v62 = vld [vmem:[#allocation5 + $0x610] ss:$24 sps:$4 sm:$0xff]  }
 0x158   :  { %2225 = vmatprep.subr.bf16.mxu1 %v3975_v0  ;;  %v4051_v63 = vld [vmem:[#allocation8] ss:$8 sps:$4 sm:$0xff]  }
 0x159   :  { %v4044_v0 = vld [vmem:[#allocation5 + $0x8e4] ss:$24 sps:$4 sm:$0xff]  }
 0x15a   :  { %2185 = vmatpush2.bf16.msra.mxu0 %v3958_v1  ;;  %v4059_v1 = vld [vmem:[#allocation8 + $0xf4] ss:$8 sps:$4 sm:$0xff]  }
 0x15b   :  { %2226 = vmatpush2.bf16.msra.mxu1 %v3973_v3  ;;  %2186 = vmatprep.subr.bf16.mxu0 %v3966_v2  ;;  %v4042_v2 = vld [vmem:[#allocation5 + $0x8e0] ss:$24 sps:$4 sm:$0xff]  }
 0x15c   :  { %2227 = vmatprep.subr.bf16.mxu1 %v3981_v4  ;;  %v4057_v3 = vld [vmem:[#allocation8 + $0xf0] ss:$8 sps:$4 sm:$0xff]  }
 0x15d   :  { %v4050_v4 = vld [vmem:[#allocation5 + $0x8b4] ss:$24 sps:$4 sm:$0xff]  }
 0x15e   :  { %2187 = vmatpush2.bf16.msra.mxu0 %v3964_v5  ;;  %v4065_v5 = vld [vmem:[#allocation8 + $0xe4] ss:$8 sps:$4 sm:$0xff]  }
 0x15f   :  { %2228 = vmatpush2.bf16.msra.mxu1 %v3979_v7  ;;  %2188 = vmatprep.subr.bf16.mxu0 %v3972_v6  ;;  %v4048_v6 = vld [vmem:[#allocation5 + $0x8b0] ss:$24 sps:$4 sm:$0xff]  }
 0x160   :  { %2229 = vmatprep.subr.bf16.mxu1 %v3987_v10  ;;  %v4063_v7 = vld [vmem:[#allocation8 + $0xe0] ss:$8 sps:$4 sm:$0xff]  }
 0x161   :  { %v4056_v10 = vld [vmem:[#allocation5 + $0x884] ss:$24 sps:$4 sm:$0xff]  }
 0x162   :  { %2189 = vmatpush2.bf16.msra.mxu0 %v3970_v11  ;;  %v4071_v11 = vld [vmem:[#allocation8 + $0xd4] ss:$8 sps:$4 sm:$0xff]  }
 0x163   :  { %2230 = vmatpush2.bf16.msra.mxu1 %v3985_v13  ;;  %2190 = vmatprep.subr.bf16.mxu0 %v3978_v12  ;;  %v4054_v12 = vld [vmem:[#allocation5 + $0x880] ss:$24 sps:$4 sm:$0xff]  }
 0x164   :  { %2231 = vmatprep.subr.bf16.mxu1 %v3993_v14  ;;  %v4069_v13 = vld [vmem:[#allocation8 + $0xd0] ss:$8 sps:$4 sm:$0xff]  }
 0x165   :  { %v4062_v14 = vld [vmem:[#allocation5 + $0x854] ss:$24 sps:$4 sm:$0xff]  }
 0x166   :  { %2191 = vmatpush2.bf16.msra.mxu0 %v3976_v15  ;;  %v4077_v15 = vld [vmem:[#allocation8 + $0xc4] ss:$8 sps:$4 sm:$0xff]  }
 0x167   :  { %2232 = vmatpush2.bf16.msra.mxu1 %v3991_v16  ;;  %2192 = vmatprep.subr.bf16.mxu0 %v3984_v18  ;;  %v4060_v16 = vld [vmem:[#allocation5 + $0x850] ss:$24 sps:$4 sm:$0xff]  }
 0x168   :  { %2233 = vmatprep.subr.bf16.mxu1 %v3999_v19  ;;  %v4075_v18 = vld [vmem:[#allocation8 + $0xc0] ss:$8 sps:$4 sm:$0xff]  }
 0x169   :  { %v4068_v19 = vld [vmem:[#allocation5 + $0x824] ss:$24 sps:$4 sm:$0xff]  }
 0x16a   :  { %2193 = vmatpush2.bf16.msra.mxu0 %v3982_v20  ;;  %v4083_v20 = vld [vmem:[#allocation8 + $0xb4] ss:$8 sps:$4 sm:$0xff]  }
 0x16b   :  { %2234 = vmatpush2.bf16.msra.mxu1 %v3997_v21  ;;  %2194 = vmatprep.subr.bf16.mxu0 %v3990_v22  ;;  %v448_v21 = vlaneseq  ;;  %v4066_v22 = vld [vmem:[#allocation5 + $0x820] ss:$24 sps:$4 sm:$0xff]  }
 0x16c   :  { %2235 = vmatprep.subr.bf16.mxu1 %v4005_v23  ;;  %v4081_v23 = vld [vmem:[#allocation8 + $0xb0] ss:$8 sps:$4 sm:$0xff]  }
 0x16e   :  { %2195 = vmatpush2.bf16.msra.mxu0 %v3988_v24  ;;  %v4074_v24 = vld [vmem:[#allocation5 + $0x7f4] ss:$24 sps:$4 sm:$0xff]  }
 0x16f   :  { %2236 = vmatpush2.bf16.msra.mxu1 %v4003_v25  ;;  %2246 = vmatprep.subr.bf16.mxu0 %v3996_v26  ;;  %v4089_v25 = vld [vmem:[#allocation8 + $0xa4] ss:$8 sps:$4 sm:$0xff]   ;;  %v4526_v26 = vshrl.u32 %v448_v21, 7  ;;  %v4132_v21 = vld [vmem:[#allocation8 + $0x1b0] ss:$8 sps:$4 sm:$0xff]  }
 0x170   :  { %2695 = vmatprep.subr.bf16.mxu1 %v4011_v27  ;;  %v4072_v27 = vld [vmem:[#allocation5 + $0x7f0] ss:$24 sps:$4 sm:$0xff]  }
 0x171   :  { %v4515_v32 = vpop.f32.mrf.mxu0  ;;  %2197 = vmatmul.mubr.bf16.vlgmr.msra.gmra.mxu0 %v4495_v8  ;;  %v4006_v8 = vld [vmem:[#allocation5 + $0x700] ss:$24 sps:$4 sm:$0xff]  }
 0x172   :  { %v4517_v33 = vpop.f32.mrf.mxu1  ;;  %2238 = vmatmul.mubr.bf16.vlgmr.msra.gmra.mxu1 %v4497_v9  ;;  %2247 = vmatpush1.bf16.msra.mxu0 %v3994_v28  ;;  %v4021_v9 = vld [vmem:[#allocation8 + $0x50] ss:$8 sps:$4 sm:$0xff]   ;;  %v4087_v28 = vld [vmem:[#allocation8 + $0xa0] ss:$8 sps:$4 sm:$0xff]  }
 0x173   :  { %2696 = vmatpush1.bf16.msra.mxu1 %v4009_v29  ;;  %v4521_v37 = vpop.f32.mrf.mxu0  ;;  %2248 = vmatprep.subr.bf16.mxu0 %v4002_v30  ;;  %v4080_v29 = vld [vmem:[#allocation5 + $0x7c4] ss:$24 sps:$4 sm:$0xff]  }
 0x174   :  { %v4523_v38 = vpop.f32.mrf.mxu1  ;;  %2697 = vmatprep.subr.bf16.mxu1 %v4017_v31  ;;  %2278 = vmatprep.mubr.bf16.mxu0 %v4502_v35  ;;  %v4035_v35 = vld [vmem:[#allocation8 + $0x34] ss:$8 sps:$4 sm:$0xff]   ;;  %v450_v31 = vsub.s32 0, %v4526_v26 }
 0x175   :  { %v1956_v41 = vpop.f32.mrf.mxu0  ;;  %v4092_v30 = vld [vmem:[#allocation8 + $0x94] ss:$8 sps:$4 sm:$0xff]  }
 0x176   :  { %v1997_v49 = vpop.f32.mrf.mxu1  ;;  %2249 = vmatpush1.bf16.msra.mxu0 %v4000_v34  ;;  %v4529_v34 = vld [vmem:[#allocation7] sm:$0x3f]  ;;  %v4086_v41 = vld [vmem:[#allocation5 + $0x794] ss:$24 sps:$4 sm:$0xff]  }
 0x177   :  { %2698 = vmatpush1.bf16.msra.mxu1 %v4015_v36  ;;  %v1957_v52 = vpop.f32.mrf.mxu0  ;;  %2250 = vmatprep.subr.bf16.mxu0 %v4008_v39  ;;  %v454_v36 = vsub.s32 1, %v4526_v26  ;;  %v4078_v39 = vld [vmem:[#allocation5 + $0x7c0] ss:$24 sps:$4 sm:$0xff]   ;;  %v4095_v49 = vld [vmem:[#allocation8 + $0x84] ss:$8 sps:$4 sm:$0xff]  }
 0x178   :  { %v1998_v42 = vpop.f32.mrf.mxu1  ;;  %2699 = vmatprep.subr.bf16.mxu1 %v4023_v40  ;;  %v4090_v40 = vld [vmem:[#allocation8 + $0x90] ss:$8 sps:$4 sm:$0xff]   ;;  %v4084_v52 = vld [vmem:[#allocation5 + $0x790] ss:$24 sps:$4 sm:$0xff]  }
 0x179   :  { %v4093_v42 = vld [vmem:[#allocation8 + $0x80] ss:$8 sps:$4 sm:$0xff]  }
 0x17a   :  { %2251 = vmatpush1.bf16.msra.mxu0 %v4006_v8  ;;  %v451_v8 = vrot.slane %v4529_v34, %v450_v31 }
 0x17b   :  { %2700 = vmatpush1.bf16.msra.mxu1 %v4021_v9  ;;  %2252 = vmatprep.subr.bf16.mxu0 %v4014_v43  ;;  %v455_v9 = vrot.slane %v4529_v34, %v454_v36  ;;  %v4098_v43 = vld [vmem:[#allocation8 + $0x174] ss:$8 sps:$4 sm:$0xff]  }
 0x17c   :  { %2701 = vmatprep.subr.bf16.mxu1 %v4029_v44  ;;  %v1953_v44 = vadd.f32 %v4515_v32, %v451_v8 }
 0x17e   :  { %2253 = vmatpush1.bf16.msra.mxu0 %v4012_v45  ;;  %v1955_v45 = vadd.f32 %v4521_v37, %v455_v9  ;;  %v4104_v37 = vld [vmem:[#allocation8 + $0x154] ss:$8 sps:$4 sm:$0xff]  }
 0x17f   :  { %2702 = vmatpush1.bf16.msra.mxu1 %v4027_v46  ;;  %2254 = vmatprep.subr.bf16.mxu0 %v4020_v47  ;;  %v4096_v46 = vld [vmem:[#allocation8 + $0x170] ss:$8 sps:$4 sm:$0xff]   ;;  %v4101_v47 = vld [vmem:[#allocation8 + $0x164] ss:$8 sps:$4 sm:$0xff]  }
 0x180   :  { %2703 = vmatprep.subr.bf16.mxu1 %v4035_v35  ;;  %v1994_v35 = vadd.f32 %v4517_v33, %v1953_v44 }
 0x182   :  { %2255 = vmatpush1.bf16.msra.mxu0 %v4018_v48 }
 0x183   :  { %2704 = vmatpush1.bf16.msra.mxu1 %v4033_v50  ;;  %2256 = vmatprep.subr.bf16.mxu0 %v4026_v51  ;;  %v1996_v51 = vadd.f32 %v4523_v38, %v1955_v45 }
 0x184   :  { %2705 = vmatprep.subr.bf16.mxu1 %v4041_v53 }
 0x186   :  { %2257 = vmatpush1.bf16.msra.mxu0 %v4024_v54  ;;  %v4099_v54 = vld [vmem:[#allocation8 + $0x160] ss:$8 sps:$4 sm:$0xff]  }
 0x187   :  { %2706 = vmatpush1.bf16.msra.mxu1 %v4039_v55  ;;  %2258 = vmatprep.subr.bf16.mxu0 %v4032_v56 }
 0x188   :  { %2707 = vmatprep.subr.bf16.mxu1 %v4047_v57 }
 0x18a   :  { %2259 = vmatpush1.bf16.msra.mxu0 %v4030_v58 }
 0x18b   :  { %2708 = vmatpush1.bf16.msra.mxu1 %v4045_v59  ;;  %2260 = vmatprep.subr.bf16.mxu0 %v4038_v60  ;;  %v4102_v60 = vld [vmem:[#allocation8 + $0x150] ss:$8 sps:$4 sm:$0xff]  }
 0x18c   :  { %2709 = vmatprep.subr.bf16.mxu1 %v4053_v61 }
 0x18e   :  { %2261 = vmatpush1.bf16.msra.mxu0 %v4036_v62 }
 0x18f   :  { %2710 = vmatpush1.bf16.msra.mxu1 %v4051_v63  ;;  %2262 = vmatprep.subr.bf16.mxu0 %v4044_v0  ;;  %v4105_v0 = vld [vmem:[#allocation8 + $0x140] ss:$8 sps:$4 sm:$0xff]  }
 0x190   :  { %2711 = vmatprep.subr.bf16.mxu1 %v4059_v1  ;;  %v4110_v1 = vld [vmem:[#allocation8 + $0x134] ss:$8 sps:$4 sm:$0xff]  }
 0x192   :  { %2263 = vmatpush2.bf16.msra.mxu0 %v4042_v2  ;;  %v4108_v2 = vld [vmem:[#allocation8 + $0x130] ss:$8 sps:$4 sm:$0xff]  }
 0x193   :  { %2712 = vmatpush2.bf16.msra.mxu1 %v4057_v3  ;;  %2264 = vmatprep.subr.bf16.mxu0 %v4050_v4  ;;  %v4113_v3 = vld [vmem:[#allocation8 + $0x124] ss:$8 sps:$4 sm:$0xff]   ;;  %v4111_v4 = vld [vmem:[#allocation8 + $0x120] ss:$8 sps:$4 sm:$0xff]  }
 0x194   :  { %2713 = vmatprep.subr.bf16.mxu1 %v4065_v5  ;;  %v4116_v5 = vld [vmem:[#allocation8 + $0x114] ss:$8 sps:$4 sm:$0xff]  }
 0x196   :  { %2265 = vmatpush2.bf16.msra.mxu0 %v4048_v6  ;;  %v4114_v6 = vld [vmem:[#allocation8 + $0x110] ss:$8 sps:$4 sm:$0xff]  }
 0x197   :  { %2714 = vmatpush2.bf16.msra.mxu1 %v4063_v7  ;;  %2266 = vmatprep.subr.bf16.mxu0 %v4056_v10  ;;  %v4119_v7 = vld [vmem:[#allocation8 + $0x104] ss:$8 sps:$4 sm:$0xff]   ;;  %v4117_v10 = vld [vmem:[#allocation8 + $0x100] ss:$8 sps:$4 sm:$0xff]  }
 0x198   :  { %2715 = vmatprep.subr.bf16.mxu1 %v4071_v11  ;;  %v4122_v11 = vld [vmem:[#allocation8 + $0x1f4] ss:$8 sps:$4 sm:$0xff]  }
 0x19a   :  { %2267 = vmatpush2.bf16.msra.mxu0 %v4054_v12  ;;  %v4120_v12 = vld [vmem:[#allocation8 + $0x1f0] ss:$8 sps:$4 sm:$0xff]  }
 0x19b   :  { %2716 = vmatpush2.bf16.msra.mxu1 %v4069_v13  ;;  %2268 = vmatprep.subr.bf16.mxu0 %v4062_v14  ;;  %v4125_v13 = vld [vmem:[#allocation8 + $0x1e4] ss:$8 sps:$4 sm:$0xff]   ;;  %v4123_v14 = vld [vmem:[#allocation8 + $0x1e0] ss:$8 sps:$4 sm:$0xff]  }
 0x19c   :  { %2717 = vmatprep.subr.bf16.mxu1 %v4077_v15  ;;  %v4128_v15 = vld [vmem:[#allocation8 + $0x1d4] ss:$8 sps:$4 sm:$0xff]  }
 0x19e   :  { %2269 = vmatpush2.bf16.msra.mxu0 %v4060_v16  ;;  %v4126_v16 = vld [vmem:[#allocation8 + $0x1d0] ss:$8 sps:$4 sm:$0xff]  }
 0x19f   :  { %2718 = vmatpush2.bf16.msra.mxu1 %v4075_v18  ;;  %2270 = vmatprep.subr.bf16.mxu0 %v4068_v19  ;;  %v4131_v18 = vld [vmem:[#allocation8 + $0x1c4] ss:$8 sps:$4 sm:$0xff]   ;;  %v4129_v19 = vld [vmem:[#allocation8 + $0x1c0] ss:$8 sps:$4 sm:$0xff]  }
 0x1a0   :  { %2719 = vmatprep.subr.bf16.mxu1 %v4083_v20  ;;  %v4134_v20 = vld [vmem:[#allocation8 + $0x1b4] ss:$8 sps:$4 sm:$0xff]  }
 0x1a2   :  { %2271 = vmatpush2.bf16.msra.mxu0 %v4066_v22  ;;  %v4137_v22 = vld [vmem:[#allocation8 + $0x1a4] ss:$8 sps:$4 sm:$0xff]  }
 0x1a3   :  { %2720 = vmatpush2.bf16.msra.mxu1 %v4081_v23  ;;  %2272 = vmatprep.subr.bf16.mxu0 %v4074_v24  ;;  %v4135_v23 = vld [vmem:[#allocation8 + $0x1a0] ss:$8 sps:$4 sm:$0xff]   ;;  %v4140_v24 = vld [vmem:[#allocation8 + $0x194] ss:$8 sps:$4 sm:$0xff]  }
 0x1a4   :  { %2721 = vmatprep.subr.bf16.mxu1 %v4089_v25  ;;  %v4138_v25 = vld [vmem:[#allocation8 + $0x190] ss:$8 sps:$4 sm:$0xff]  }
 0x1a6   :  { %2273 = vmatpush2.bf16.msra.mxu0 %v4072_v27  ;;  %v4143_v27 = vld [vmem:[#allocation8 + $0x184] ss:$8 sps:$4 sm:$0xff]  }
 0x1a7   :  { %2722 = vmatpush2.bf16.msra.mxu1 %v4087_v28  ;;  %2274 = vmatprep.subr.bf16.mxu0 %v4080_v29  ;;  %v458_v28 = vsub.s32 2, %v4526_v26  ;;  %v462_v29 = vsub.s32 3, %v4526_v26 }
 0x1a8   :  { %2723 = vmatprep.subr.bf16.mxu1 %v4092_v30  ;;  %v4141_v30 = vld [vmem:[#allocation8 + $0x180] ss:$8 sps:$4 sm:$0xff]  }
 0x1aa   :  { %2275 = vmatpush2.bf16.msra.mxu0 %v4078_v39  ;;  %v459_v39 = vrot.slane %v4529_v34, %v458_v28 }
 0x1ab   :  { %2724 = vmatpush2.bf16.msra.mxu1 %v4090_v40  ;;  %2276 = vmatprep.subr.bf16.mxu0 %v4086_v41  ;;  %v463_v40 = vrot.slane %v4529_v34, %v462_v29 }
 0x1ac   :  { %2725 = vmatprep.subr.bf16.mxu1 %v4095_v49 }
 0x1ae   :  { %2277 = vmatpush2.bf16.msra.mxu0 %v4084_v52 }
 0x1af   :  { %2726 = vmatpush2.bf16.msra.mxu1 %v4093_v42  ;;  %2736 = vmatprep.subr.bf16.mxu0 %v4098_v43 }
 0x1b1   :  { %v2034_v48 = vpop.f32.mrf.mxu0  ;;  %2279 = vmatmul.mubr.bf16.vlgmr.msra.gmra.mxu0 %v4505_v17  ;;  %v4107_v17 = vld [vmem:[#allocation8 + $0x144] ss:$8 sps:$4 sm:$0xff]  }
 0x1b2   :  { %v4541_v50 = vpop.f32.mrf.mxu1  ;;  %v2035_v53 = vadd.f32 %v2034_v48, %v1994_v35  ;;  %2737 = vmatpush1.bf16.msra.mxu0 %v4096_v46 }
 0x1b3   :  { %v2036_v32 = vpop.f32.mrf.mxu0  ;;  %2738 = vmatprep.subr.bf16.mxu0 %v4101_v47  ;;  %v2076_v41 = vadd.f32 %v4541_v50, %v459_v39  ;;  %v4144_v50 = vld [vmem:[#allocation11 + $0x78] sm:$0xff]  }
 0x1b4   :  { %v4545_v55 = vpop.f32.mrf.mxu1  ;;  %v2037_v56 = vadd.f32 %v2036_v32, %v1996_v51  ;;  %v2287_v57 = vmax.f32 %v2035_v53, 0.0  ;;  %3556 = vmatprep.subr.bf16.mxu1 %v4144_v50 }
 0x1b5   :  { %v2038_v58 = vpop.f32.mrf.mxu0  ;;  %v2078_v9 = vadd.f32 %v4545_v55, %v463_v40  ;;  %v4147_v55 = vld [vmem:[#allocation11 + $0x30] sm:$0xff]  }
 0x1b6   :  { %v2079_v59 = vpop.f32.mrf.mxu1  ;;  %v2288_v33 = vmax.f32 %v2037_v56, 0.0  ;;  %2739 = vmatpush1.bf16.msra.mxu0 %v4099_v54  ;;  %v2293_v63 = vpack.c.bf16 %v2287_v57, %v2287_v57  ;;  %v4145_v56 = vld [vmem:[#allocation11 + $0x38] sm:$0xff]   ;;  %v4146_v57 = vld [vmem:[#allocation11 + $0x70] sm:$0xff]   ;;  %v4148_v58 = vld [vmem:[#allocation11 + $0x68] sm:$0xff]  }
 0x1b7   :  { %v2039_v61 = vpop.f32.mrf.mxu0  ;;  %2740 = vmatprep.subr.bf16.mxu0 %v4104_v37  ;;  %v4149_v59 = vld [vmem:[#allocation11 + $0x28] sm:$0xff]  }
 0x1b8   :  { %v2080_v62 = vpop.f32.mrf.mxu1  ;;  %v2294_v38 = vpack.c.bf16 %v2288_v33, %v2288_v33  ;;  %v4150_v33 = vld [vmem:[#allocation11 + $0x60] sm:$0xff]   ;;  %v4152_v61 = vld [vmem:[#allocation11 + $0x58] sm:$0xff]  }
 0x1b9   :  { %v4153_v62 = vld [vmem:[#allocation11 + $0x18] sm:$0xff]  }
 0x1ba   :  { %2727 = vmatprep.mubr.bf16.mxu1 %v2294_v38  ;;  %2741 = vmatpush1.bf16.msra.mxu0 %v4102_v60  ;;  %v4151_v60 = vld [vmem:[#allocation11 + $0x20] sm:$0xff]   ;;  %v4155_v38 = vld [vmem:[#allocation11 + $0x10] sm:$0xff]  }
 0x1bb   :  { %2728 = vmatmul.mubr.bf16.vlgmr.msra.gmra.mxu1 %v2293_v63  ;;  %2742 = vmatprep.subr.bf16.mxu0 %v4107_v17  ;;  %v4154_v17 = vld [vmem:[#allocation11 + $0x50] sm:$0xff]   ;;  %v466_v63 = vsub.s32 4, %v4526_v26 }
 0x1bc   :  { %3557 = vmatpush3.bf16.msra.mxu1 %v4145_v56  ;;  %v4166_v56 = vld [vmem:[#allocation14 + $0x60] sm:$0xff]  }
 0x1bd   :  { %3558 = vmatprep.subr.bf16.mxu1 %v4146_v57  ;;  %v4167_v57 = vld [vmem:[#allocation14 + $0x20] sm:$0xff]  }
 0x1be   :  { %2743 = vmatpush1.bf16.msra.mxu0 %v4105_v0  ;;  %v470_v0 = vsub.s32 5, %v4526_v26  ;;  %v4163_v26 = vld [vmem:[#allocation14 + $0x30] sm:$0xff]  }
 0x1bf   :  { %2744 = vmatprep.subr.bf16.mxu0 %v4110_v1  ;;  %v467_v1 = vrot.slane %v4529_v34, %v466_v63 }
 0x1c0   :  { %3559 = vmatpush3.bf16.msra.mxu1 %v4147_v55  ;;  %v4168_v55 = vld [vmem:[#allocation14 + $0x58] sm:$0xff]  }
 0x1c1   :  { %3560 = vmatprep.subr.bf16.mxu1 %v4148_v58  ;;  %v4169_v58 = vld [vmem:[#allocation14 + $0x18] sm:$0xff]  }
 0x1c2   :  { %2745 = vmatpush1.bf16.msra.mxu0 %v4108_v2  ;;  %v471_v2 = vrot.slane %v4529_v34, %v470_v0  ;;  %v4160_v34 = vld [vmem:[#allocation14 + $0x78] sm:$0xff]  }
 0x1c3   :  { %2746 = vmatprep.subr.bf16.mxu0 %v4113_v3 }
 0x1c4   :  { %3561 = vmatpush3.bf16.msra.mxu1 %v4149_v59  ;;  %v4170_v59 = vld [vmem:[#allocation14 + $0x50] sm:$0xff]  }
 0x1c5   :  { %3562 = vmatprep.subr.bf16.mxu1 %v4150_v33  ;;  %v4171_v33 = vld [vmem:[#allocation14 + $0x10] sm:$0xff]  }
 0x1c6   :  { %2747 = vmatpush1.bf16.msra.mxu0 %v4111_v4 }
 0x1c7   :  { %2748 = vmatprep.subr.bf16.mxu0 %v4116_v5 }
 0x1c8   :  { %3563 = vmatpush3.bf16.msra.mxu1 %v4151_v60  ;;  %v4172_v60 = vld [vmem:[#allocation14 + $0x48] sm:$0xff]  }
 0x1c9   :  { %3564 = vmatprep.subr.bf16.mxu1 %v4152_v61  ;;  %v4173_v61 = vld [vmem:[#allocation14 + $0x8] sm:$0xff]  }
 0x1ca   :  { %2749 = vmatpush1.bf16.msra.mxu0 %v4114_v6 }
 0x1cb   :  { %2750 = vmatprep.subr.bf16.mxu0 %v4119_v7 }
 0x1cc   :  { %3565 = vmatpush3.bf16.msra.mxu1 %v4153_v62  ;;  %v4174_v62 = vld [vmem:[#allocation14 + $0x40] sm:$0xff]  }
 0x1cd   :  { %3566 = vmatprep.subr.bf16.mxu1 %v4154_v17  ;;  %v4175_v17 = vld [vmem:[#allocation14] sm:$0xff]  }
 0x1ce   :  { %2751 = vmatpush1.bf16.msra.mxu0 %v4117_v10 }
 0x1cf   :  { %2752 = vmatprep.subr.bf16.mxu0 %v4122_v11 }
 0x1d0   :  { %3567 = vmatpush3.bf16.msra.mxu1 %v4155_v38 }
 0x1d2   :  { %2753 = vmatpush2.bf16.msra.mxu0 %v4120_v12 }
 0x1d3   :  { %2754 = vmatprep.subr.bf16.mxu0 %v4125_v13 }
 0x1d6   :  { %2755 = vmatpush2.bf16.msra.mxu0 %v4123_v14 }
 0x1d7   :  { %2756 = vmatprep.subr.bf16.mxu0 %v4128_v15 }
 0x1da   :  { %2757 = vmatpush2.bf16.msra.mxu0 %v4126_v16 }
 0x1db   :  { %2758 = vmatprep.subr.bf16.mxu0 %v4131_v18  ;;  %v4156_v18 = vld [vmem:[#allocation11 + $0x48] sm:$0xff]  }
 0x1dc   :  { %3568 = vmatprep.subr.bf16.mxu1 %v4156_v18 }
 0x1de   :  { %2759 = vmatpush2.bf16.msra.mxu0 %v4129_v19  ;;  %v4157_v19 = vld [vmem:[#allocation11 + $0x8] sm:$0xff]  }
 0x1df   :  { %2760 = vmatprep.subr.bf16.mxu0 %v4134_v20  ;;  %3569 = vmatpush3.bf16.msra.mxu1 %v4157_v19  ;;  %v4158_v20 = vld [vmem:[#allocation11 + $0x40] sm:$0xff]  }
 0x1e0   :  { %3570 = vmatprep.subr.bf16.mxu1 %v4158_v20 }
 0x1e2   :  { %2761 = vmatpush2.bf16.msra.mxu0 %v4132_v21  ;;  %v4159_v21 = vld [vmem:[#allocation11] sm:$0xff]  }
 0x1e3   :  { %2762 = vmatprep.subr.bf16.mxu0 %v4137_v22  ;;  %3571 = vmatpush3.bf16.msra.mxu1 %v4159_v21 }
 0x1e4   :  { %3578 = vmatprep.subr.bf16.mxu1 %v4160_v34 }
 0x1e6   :  { %2763 = vmatpush2.bf16.msra.mxu0 %v4135_v23 }
 0x1e7   :  { %2764 = vmatprep.subr.bf16.mxu0 %v4140_v24 }
 0x1ea   :  { %2765 = vmatpush2.bf16.msra.mxu0 %v4138_v25 }
 0x1eb   :  { %2766 = vmatprep.subr.bf16.mxu0 %v4143_v27 }
 0x1ee   :  { %2767 = vmatpush2.bf16.msra.mxu0 %v4141_v30 }
 0x1f1   :  { %v2116_v49 = vpop.f32.mrf.mxu0 }
 0x1f2   :  { %v2157_v8 = vpop.f32.mrf.mxu1  ;;  %v2117_v52 = vadd.f32 %v2116_v49, %v2076_v41  ;;  %v2363_v41 = vld [vmem:[#allocation10] sm:$0x3] }
 0x1f3   :  { %v2118_v42 = vpop.f32.mrf.mxu0  ;;  %v2368_v49 = vrot.slane %v2363_v41, %v450_v31  ;;  %v4164_v31 = vld [vmem:[#allocation14 + $0x68] sm:$0xff]  }
 0x1f4   :  { %v2159_v43 = vpop.f32.mrf.mxu1  ;;  %v2158_v44 = vadd.f32 %v2157_v8, %v2117_v52  ;;  %v2119_v45 = vadd.f32 %v2118_v42, %v2078_v9  ;;  %v2372_v8 = vrot.slane %v2363_v41, %v454_v36  ;;  %v4165_v36 = vld [vmem:[#allocation14 + $0x28] sm:$0xff]  }
 0x1f5   :  { %v2120_v46 = vpop.f32.mrf.mxu0 }
 0x1f6   :  { %v2161_v47 = vpop.f32.mrf.mxu1  ;;  %v2160_v35 = vadd.f32 %v2159_v43, %v2119_v45  ;;  %v2289_v48 = vmax.f32 %v2158_v44, 0.0 }
 0x1f7   :  { %v2121_v51 = vpop.f32.mrf.mxu0 }
 0x1f8   :  { %v2162_v53 = vpop.f32.mrf.mxu1  ;;  %v2290_v54 = vmax.f32 %v2160_v35, 0.0  ;;  %v2295_v37 = vpack.c.bf16 %v2289_v48, %v2289_v48 }
 0x1fa   :  { %v2296_v32 = vpack.c.bf16 %v2290_v54, %v2290_v54  ;;  %v4161_v54 = vld [vmem:[#allocation14 + $0x38] sm:$0xff]  }
 0x1fc   :  { %2768 = vmatprep.mubr.bf16.mxu0 %v2296_v32 }
 0x1fd   :  { %2769 = vmatmul.mubr.bf16.vlgmr.msra.gmra.mxu0 %v2295_v37  ;;  %v4162_v37 = vld [vmem:[#allocation14 + $0x70] sm:$0xff]  }
 0x231   :  { %v2198_v3 = vpop.f32.mrf.mxu0 }
 0x232   :  { %v2239_v4 = vpop.f32.mrf.mxu1  ;;  %v2199_v5 = vadd.f32 %v2198_v3, %v467_v1 }
 0x233   :  { %v2200_v6 = vpop.f32.mrf.mxu0 }
 0x234   :  { %v2241_v7 = vpop.f32.mrf.mxu1  ;;  %v2201_v10 = vadd.f32 %v2200_v6, %v471_v2  ;;  %v2240_v11 = vadd.f32 %v2239_v4, %v2199_v5  ;;  %v3522_v2 = vld [vmem:[#allocation13] ss:$0 sm:$0xff] }
 0x235   :  { %v2202_v12 = vpop.f32.mrf.mxu0 }
 0x236   :  { %v2243_v13 = vpop.f32.mrf.mxu1  ;;  %v2242_v14 = vadd.f32 %v2241_v7, %v2201_v10 }
 0x237   :  { %v2203_v15 = vpop.f32.mrf.mxu0 }
 0x238   :  { %v2244_v16 = vpop.f32.mrf.mxu1 }
 0x271   :  { %v2280_v22 = vpop.f32.mrf.mxu0 }
 0x272   :  { %v2281_v23 = vadd.f32 %v2280_v22, %v2240_v11  ;;  %v3539_v11 = vld [vmem:[#allocation16] ss:$0 sm:$0xff] }
 0x273   :  { %v2282_v24 = vpop.f32.mrf.mxu0 }
 0x274   :  { %v2283_v25 = vadd.f32 %v2282_v24, %v2242_v14  ;;  %v2291_v38 = vmax.f32 %v2281_v23, 0.0 }
 0x275   :  { %v2284_v27 = vpop.f32.mrf.mxu0 }
 0x276   :  { %v2292_v35 = vmax.f32 %v2283_v25, 0.0  ;;  %v2297_v63 = vpack.c.bf16 %v2291_v38, %v2291_v38 }
 0x277   :  { %v2285_v28 = vpop.f32.mrf.mxu0 }
 0x278   :  { %v2298_v50 = vpack.c.bf16 %v2292_v35, %v2292_v35 }
 0x27b   :  { %v2729_v29 = vpop.f32.mrf.mxu1 }
 0x27c   :  { %v2730_v9 = vadd.f32 %v2729_v29, %v2368_v49 }
 0x27d   :  { %v2731_v30 = vpop.f32.mrf.mxu1 }
 0x27e   :  { %v2732_v42 = vadd.f32 %v2731_v30, %v2372_v8 }
 0x27f   :  { %v2733_v39 = vpop.f32.mrf.mxu1 }
 0x281   :  { %v2734_v40 = vpop.f32.mrf.mxu1 }
 0x2bd   :  { %v2770_v52 = vpop.f32.mrf.mxu0 }
 0x2be   :  { %v2771_v43 = vadd.f32 %v2770_v52, %v2730_v9 }
 0x2bf   :  { %v2772_v44 = vpop.f32.mrf.mxu0 }
 0x2c0   :  { %v2773_v45 = vadd.f32 %v2772_v44, %v2732_v42  ;;  %v2777_v46 = vmax.f32 %v2771_v43, 0.0 }
 0x2c1   :  { %v2774_v47 = vpop.f32.mrf.mxu0 }
 0x2c2   :  { %v2778_v48 = vmax.f32 %v2773_v45, 0.0  ;;  %v2779_v32 = vpack.c.bf16 %v2777_v46, %v2777_v46 }
 0x2c3   :  { %v2775_v51 = vpop.f32.mrf.mxu0 }
 0x2c4   :  { %v2780_v53 = vpack.c.bf16 %v2778_v48, %v2778_v48 }
 0x2c6   :  { %2948 = vmatprep.mubr.bf16.mxu1 %v2780_v53 }
 0x2c7   :  { %2949 = vmatmul.mubr.bf16.vlgmr.msra.gmra.mxu1 %v2779_v32 }
 0x2c8   :  { %3579 = vmatpush3.bf16.msra.mxu1 %v4161_v54  ;;  %3123 = vmatprep.mubr.bf16.mxu1 %v2298_v50 }
 0x2c9   :  { %3580 = vmatprep.subr.bf16.mxu1 %v4162_v37 }
 0x2cc   :  { %3581 = vmatpush3.bf16.msra.mxu1 %v4163_v26 }
 0x2cd   :  { %3582 = vmatprep.subr.bf16.mxu1 %v4164_v31 }
 0x2d0   :  { %3583 = vmatpush3.bf16.msra.mxu1 %v4165_v36 }
 0x2d1   :  { %3584 = vmatprep.subr.bf16.mxu1 %v4166_v56 }
 0x2d4   :  { %3585 = vmatpush3.bf16.msra.mxu1 %v4167_v57 }
 0x2d5   :  { %3586 = vmatprep.subr.bf16.mxu1 %v4168_v55 }
 0x2d8   :  { %3587 = vmatpush3.bf16.msra.mxu1 %v4169_v58 }
 0x2d9   :  { %3588 = vmatprep.subr.bf16.mxu1 %v4170_v59 }
 0x2dc   :  { %3589 = vmatpush3.bf16.msra.mxu1 %v4171_v33 }
 0x2dd   :  { %3590 = vmatprep.subr.bf16.mxu1 %v4172_v60 }
 0x2e0   :  { %3591 = vmatpush3.bf16.msra.mxu1 %v4173_v61 }
 0x2e1   :  { %3592 = vmatprep.subr.bf16.mxu1 %v4174_v62 }
 0x2e4   :  { %3593 = vmatpush3.bf16.msra.mxu1 %v4175_v17 }
 0x2e7   :  { %3124 = vmatmul.mubr.bf16.vlgmr.msra.gmra.mxu1 %v2297_v63 }
 0x387   :  { %v3572_v0 = vpop.f32.mrf.mxu1 }
 0x389   :  { %v3573_v1 = vpop.f32.mrf.mxu1 }
 0x38a   :  { %v3574_v3 = vadd.f32 %v3573_v1, %v3572_v0 }
 0x38b   :  { %v3575_v4 = vpop.f32.mrf.mxu1 }
 0x38c   :  { %v2951_v5 = vadd.f32 %v3574_v3, %v3522_v2 }
 0x38d   :  { %v3576_v6 = vpop.f32.mrf.mxu1 }
 0x38e   :  { %3131 = vmax.xlane.f32.xlu0 %v2951_v5 }
 0x3a7   :  { %v3594_v7 = vpop.f32.mrf.mxu1 }
 0x3a9   :  { %v3595_v10 = vpop.f32.mrf.mxu1 }
 0x3aa   :  { %v3596_v12 = vadd.f32 %v3595_v10, %v3594_v7 }
 0x3ab   :  { %v3597_v13 = vpop.f32.mrf.mxu1 }
 0x3ac   :  { %v3126_v14 = vadd.f32 %v3596_v12, %v3539_v11 }
 0x3ad   :  { %v3598_v15 = vpop.f32.mrf.mxu1 }
 0x3ae   :  { %3140 = vmax.xlane.f32.xlu0 %v3126_v14 }
 0x417   :  { %v3132_v16 = vpop.xlane.xlu0 %3131 }
 0x418   :  { %v3133_v18 = vsub.f32 %v2951_v5, %v3132_v16 }
 0x41a   :  { %v3134_v19 = vmul.f32 1.442695, %v3133_v18 }
 0x41c   :  { %4176 = vpow2.f32 %v3134_v19 }
 0x429   :  { %v4177_v20 = vpop.eup %4176 }
 0x42a   :  { %3136 = vadd.xlane.f32.xlu1 %v4177_v20 }
 0x437   :  { %v3141_v21 = vpop.xlane.xlu0 %3140 }
 0x438   :  { %v3142_v34 = vsub.f32 %v3126_v14, %v3141_v21 }
 0x43a   :  { %v3143_v22 = vmul.f32 1.442695, %v3142_v34 }
 0x43c   :  { %4178 = vpow2.f32 %v3143_v22 }
 0x449   :  { %v4179_v23 = vpop.eup %4178 }
 0x44a   :  { %3145 = vadd.xlane.f32.xlu1 %v4179_v23 }
 0x4b3   :  { %v3137_v24 = vpop.xlane.xlu1 %3136 }
 0x4b4   :  { %4180 = vrcp.f32 %v3137_v24 }
 0x4c1   :  { %v4181_v27 = vpop.eup %4180 }
 0x4c2   :  { %v3139_v29 = vmul.f32 %v4181_v27, %v4177_v20 }
 0x4d3   :  { %v3146_v25 = vpop.xlane.xlu1 %3145 }
 0x4d4   :  { %4182 = vrcp.f32 %v3146_v25 }
 0x4e1   :  { %v4183_v28 = vpop.eup %4182 }
 0x4e2   :  { %v3148_v30 = vmul.f32 %v4183_v28, %v4179_v23 }
 0x4e4   :  { %v3149_v39 = vadd.f32 %v3148_v30, %v3139_v29 }
 0x4e6   :  { %3150 = vst [vmem:[#allocation17] sm:$0xff] %v3149_v39 }
 0x4e7   :  { %4375 = shalt.err (!%p4372_p7)
}
 0x4e8   :  { %3160 = dma.vmem_to_hbm [thread:$0]  %s3158_s8, 128, %s4573_s9, [#allocation4]  }
 0x4e9   :  { %4394 = dma.done.wait [#allocation4], 128  }
 0x4ea   :  { %4395 = vsyncadd [#allocation4], 4294967168 }
 0x4eb   :  { %3164 = vsyncpa [#allocation3], 1 }
 0x4ec   :  { %3165 = vsyncpa [#allocation6], 1 }
 0x4ed   :  { %3166 = vsyncpa [#allocation9], 1 }
 0x4ee   :  { %3167 = vsyncpa [#allocation12], 1 }
 0x4ef   :  { %3168 = vsyncpa [#allocation15], 1 }
 0x4f0   :  { %3169 = vsyncpa [#allocation4], 1 }

</bundles_post_ra>
